<compile_context>
chip_gen: v7x
topology: tpu7x:2x2x1
jax: 0.10.0
libtpu: 0.0.40
codegen_flags: <defaults>
</compile_context>

<pallas_src>
import functools
import math

import jax
import jax.numpy as jnp
import numpy as np
from jax.experimental import pallas as pl
from jax.experimental.pallas import tpu as pltpu

LANE = 128  # TPU lane width: packed conv-output width and FC pad width.


# ----------------------------- Pallas kernel --------------------------------
def _textcnn_kernel(dyn_ref, sta_ref, w_ref, bias_ref, mask_ref, fcw_ref,
                    fcb_ref, out_ref, *, n_shift):
    # dyn_ref/sta_ref : (TB, L, E)            bf16  embedded tokens (channel-last)
    # w_ref           : (n_shift, 2E, 128)    bf16  packed conv weights (per tap)
    # bias_ref        : (1, 128)              f32   packed conv biases (branch blocks)
    # mask_ref        : (1, L, 128)           f32   precomputed time-validity mask
    # fcw_ref         : (128, 128)            bf16  zero-padded FC weight (W.T)
    # fcb_ref         : (1, 128)              f32   zero-padded FC bias
    # out_ref         : (TB, 128)             f32   padded logits (cols 0..1 real)
    tb, seq_len, e_dim = dyn_ref.shape
    m = tb * seq_len

    # Merge the dyn/sta channel halves in VMEM: one lane-aligned copy of two
    # (M, 128) bf16 slabs -> K = 2E = 256 per matmul (fills v6e/v7x MXU depth).
    emb = jnp.concatenate(
        [dyn_ref[...].reshape(m, e_dim), sta_ref[...].reshape(m, e_dim)],
        axis=-1)                                             # (M, 2E) bf16

    # conv[t] = sum_s (emb @ W_s)[t + s].  Each tap is a K=256, N=128 dot with
    # f32 accumulation; the time shift is an f32 sublane roll (XLU slot, idle
    # otherwise).  Rows that pick up wrapped / cross-batch data (t >= L - s)
    # are zeroed by the precomputed mask below, before the max-pool.
    acc = jnp.dot(emb, w_ref[0], preferred_element_type=jnp.float32)
    for s in range(1, n_shift):
        d = jnp.dot(emb, w_ref[s], preferred_element_type=jnp.float32)
        acc = acc + pltpu.roll(d, shift=m - s, axis=0)

    # bias + ReLU (f32 VPU), then the precomputed time-validity mask (safe:
    # post-ReLU values are >= 0 and every branch has Lout >= 1).
    acc = jnp.maximum(acc + bias_ref[...], 0.0)              # (M, 128) f32
    acc = acc.reshape(tb, seq_len, LANE) * mask_ref[...]     # (TB, L, 128)

    pooled = jnp.max(acc, axis=1)                            # (TB, 128), lane-dense

    # TODO(synk): nn.Dropout is identity here (eval-mode semantics).
    out_ref[...] = (jnp.dot(pooled.astype(jnp.bfloat16), fcw_ref[...],
                            preferred_element_type=jnp.float32)
                    + fcb_ref[...])


# --------------------------- host-side packing --------------------------------
def _pack_params(params, kernel_sizes):
    """Pack conv / fc params into the fused lane-dense layout (numpy, once)."""
    hidden = params["conv_w0"].shape[0]
    c_in = params["conv_w0"].shape[1]                 # 2 * E
    n_branch = len(kernel_sizes)
    n_shift = max(kernel_sizes)

    # W[s, :, b*H:(b+1)*H] = conv_w{b}[:, :, s].T   (zero for s >= ks_b / pad cols)
    w = np.zeros((n_shift, c_in, LANE), np.float32)
    bias = np.zeros((1, LANE), np.float32)
    for b, ksz in enumerate(kernel_sizes):
        wb = np.asarray(params[f"conv_w{b}"], np.float32)   # (H, C, ks) PyTorch layout
        for s in range(ksz):
            w[s, :, b * hidden:(b + 1) * hidden] = wb[:, :, s].T
        bias[0, b * hidden:(b + 1) * hidden] = np.asarray(params[f"conv_b{b}"],
                                                          np.float32)

    # PyTorch Linear: y = x @ W.T + b; pad to 128 lanes for unmasked stores.
    fcw = np.zeros((LANE, LANE), np.float32)
    fcw[:n_branch * hidden, :2] = np.asarray(params["fc_w"], np.float32).T
    fcb = np.zeros((1, LANE), np.float32)
    fcb[0, :2] = np.asarray(params["fc_b"], np.float32)

    return (jnp.asarray(params["dyn_emb"], jnp.bfloat16),
            jnp.asarray(params["sta_emb"], jnp.bfloat16),
            jnp.asarray(w, jnp.bfloat16),
            jnp.asarray(bias),
            jnp.asarray(fcw, jnp.bfloat16),
            jnp.asarray(fcb),
            hidden)


def _time_mask(seq_len, kernel_sizes, hidden):
    """(1, L, 128) f32: 1 where conv output position is valid, else 0."""
    m = np.zeros((1, seq_len, LANE), np.float32)
    t = np.arange(seq_len)[:, None]
    for b, ksz in enumerate(kernel_sizes):
        m[0, :, b * hidden:(b + 1) * hidden] = (t < seq_len - ksz + 1)
    return jnp.asarray(m)


def _pick_batch_tile(batch, seq_len, max_rows):
    """One big grid step when the whole batch fits (single-TC v5e/v6e sweet spot).

    On v7x pass a smaller max_rows to split the 'parallel' batch axis into >=2
    (ideally even) steps so both TensorCores are used.
    """
    if batch * seq_len <= max_rows:
        return batch
    for d in range(batch, 0, -1):
        if batch % d == 0 and d * seq_len <= max_rows and (d % 8 == 0 or d == batch):
            return d
    return math.gcd(batch, 8)


# ------------------------------- forward builder -------------------------------
def make_textcnn_forward(params, kernel_sizes=(3, 4, 5), max_rows_per_step=2048):
    """Pack params once; return a jitted forward(tokens) -> (B, 2) logits."""
    kernel_sizes = tuple(kernel_sizes)
    n_shift = max(kernel_sizes)
    e_dim = params["dyn_emb"].shape[1]

    dyn_tab, sta_tab, w, bias, fcw, fcb, hidden = _pack_params(params, kernel_sizes)
    kernel = functools.partial(_textcnn_kernel, n_shift=n_shift)

    @jax.jit
    def forward(tokens):
        B, L = tokens.shape
        assert L >= n_shift, "sequence shorter than the largest conv kernel size"

        # Embedding lookups in bf16 (halves HBM traffic); the dyn/sta channel
        # concat is done inside the kernel (VMEM), never materialized in HBM.
        dyn = jnp.take(dyn_tab, tokens, axis=0)            # (B, L, E) bf16
        sta = jnp.take(sta_tab, tokens, axis=0)

        tb = _pick_batch_tile(B, L, max_rows_per_step)
        mask = _time_mask(L, kernel_sizes, hidden)         # trace-time constant

        out = pl.pallas_call(
            kernel,
            out_shape=jax.ShapeDtypeStruct((B, LANE), jnp.float32),
            grid=(B // tb,),
            in_specs=[
                pl.BlockSpec((tb, L, e_dim), lambda i: (i, 0, 0)),          # dyn tile
                pl.BlockSpec((tb, L, e_dim), lambda i: (i, 0, 0)),          # sta tile
                pl.BlockSpec((n_shift, 2 * e_dim, LANE), lambda i: (0, 0, 0)),  # conv W
                pl.BlockSpec((1, LANE), lambda i: (0, 0)),                  # conv bias
                pl.BlockSpec((1, L, LANE), lambda i: (0, 0, 0)),            # time mask
                pl.BlockSpec((LANE, LANE), lambda i: (0, 0)),               # fc weight
                pl.BlockSpec((1, LANE), lambda i: (0, 0)),                  # fc bias
            ],
            out_specs=pl.BlockSpec((tb, LANE), lambda i: (i, 0)),
            compiler_params=pltpu.CompilerParams(
                dimension_semantics=("parallel",),      # v7x 2-TC split over batch
                vmem_limit_bytes=32 * 1024 * 1024),
        )(dyn, sta, w, bias, mask, fcw, fcb)

        return out[:, :2]                                  # drop the lane padding

    return forward


# --------------------------- pure-JAX reference --------------------------------
def textcnn_reference(tokens, params, *, kernel_sizes=(3, 4, 5)):
    dyn = jnp.take(params["dyn_emb"], tokens, axis=0)
    sta = jnp.take(params["sta_emb"], tokens, axis=0)
    emb = jnp.concatenate([dyn, sta], axis=-1)             # (B, L, 2E)
    B, L, _ = emb.shape
    pooled = []
    for b, ksz in enumerate(kernel_sizes):
        w = params[f"conv_w{b}"]                           # (H, C, ks)
        bias = params[f"conv_b{b}"]                        # (H,)
        lout = L - ksz + 1
        acc = jnp.zeros((B, lout, w.shape[0]), jnp.float32)
        for k in range(ksz):
            acc = acc + jnp.einsum("blc,hc->blh", emb[:, k:k + lout, :], w[:, :, k])
        acc = jnp.maximum(acc + bias[None, None, :], 0.0)
        pooled.append(jnp.max(acc, axis=1))
    cat = jnp.concatenate(pooled, axis=-1)                 # (B, 3H)
    return cat @ params["fc_w"].T + params["fc_b"][None, :]


# --------------------------------- main ----------------------------------------
if __name__ == "__main__":
    VOCAB = 50
    E = 128          # embedding_dim (PyTorch default 300, shrunk; lane-dense)
    H = 32           # hidden_dim
    KS = (3, 4, 5)
    B, L = 16, 16
    C = 2 * E        # conv in_channels = embedding_dim * 2

    key = jax.random.PRNGKey(0)
    k = jax.random.split(key, 16)

    params = {
        "dyn_emb": jax.random.normal(k[0], (VOCAB, E), jnp.float32) * 0.1,
        "sta_emb": jax.random.normal(k[1], (VOCAB, E), jnp.float32) * 0.1,
        "fc_w": jax.random.normal(k[2], (2, 3 * H), jnp.float32) * 0.05,   # PyTorch (out, in)
        "fc_b": jax.random.normal(k[3], (2,), jnp.float32) * 0.05,
    }
    for b, ksz in enumerate(KS):
        params[f"conv_w{b}"] = jax.random.normal(
            k[4 + 2 * b], (H, C, ksz), jnp.float32) * 0.05                  # PyTorch Conv1d layout
        params[f"conv_b{b}"] = jax.random.normal(
            k[5 + 2 * b], (H,), jnp.float32) * 0.05

    tokens = jax.random.randint(k[12], (B, L), 0, VOCAB, dtype=jnp.int32)

    forward = make_textcnn_forward(params, kernel_sizes=KS)   # packs params once
    out = jax.block_until_ready(forward(tokens))
    ref = jax.block_until_ready(textcnn_reference(tokens, params, kernel_sizes=KS))

    # bf16 MXU inputs (emb / conv W / fc W) with f32 accumulation vs. f32 reference.
    np.testing.assert_allclose(np.asarray(out), np.asarray(ref), rtol=2e-2, atol=1e-2)

    assert out.shape == (B, 2) and out.dtype == jnp.float32
    print("KERNEL_OK")
</pallas_src>

<mosaic_0001>
module attributes {stable_mosaic.version = 11 : i64} {
  func.func @_textcnn_kernel(%arg0: i32, %arg1: memref<16x16x128xbf16, #tpu.memory_space<vmem>>, %arg2: memref<16x16x128xbf16, #tpu.memory_space<vmem>>, %arg3: memref<5x256x128xbf16, #tpu.memory_space<vmem>>, %arg4: memref<1x128xf32, #tpu.memory_space<vmem>>, %arg5: memref<1x16x128xf32, #tpu.memory_space<vmem>>, %arg6: memref<128x128xbf16, #tpu.memory_space<vmem>>, %arg7: memref<1x128xf32, #tpu.memory_space<vmem>>, %arg8: memref<16x128xf32, #tpu.memory_space<vmem>>) attributes {dimension_semantics = [#tpu.dimension_semantics<parallel>], iteration_bounds = array<i64: 1>, scalar_prefetch = 0 : i64, scratch_operands = 0 : i64, tpu.core_type = #tpu.core_type<tc>, window_params = [{transform_indices = @transform_0, window_bounds = array<i64: 16, 16, 128>}, {transform_indices = @transform_1, window_bounds = array<i64: 16, 16, 128>}, {pipeline_mode = #tpu.pipeline_mode<synchronous>, transform_indices = @transform_2, window_bounds = array<i64: 5, 256, 128>}, {pipeline_mode = #tpu.pipeline_mode<synchronous>, transform_indices = @transform_3, window_bounds = array<i64: 1, 128>}, {pipeline_mode = #tpu.pipeline_mode<synchronous>, transform_indices = @transform_4, window_bounds = array<i64: 1, 16, 128>}, {pipeline_mode = #tpu.pipeline_mode<synchronous>, transform_indices = @transform_5, window_bounds = array<i64: 128, 128>}, {pipeline_mode = #tpu.pipeline_mode<synchronous>, transform_indices = @transform_6, window_bounds = array<i64: 1, 128>}, {transform_indices = @transform_7, window_bounds = array<i64: 16, 128>}]} {
    %c0 = arith.constant 0 : index
    %c0_0 = arith.constant 0 : index
    %c0_1 = arith.constant 0 : index
    %0 = vector.load %arg1[%c0, %c0_0, %c0_1] : memref<16x16x128xbf16, #tpu.memory_space<vmem>>, vector<16x16x128xbf16>
    %1 = vector.shape_cast %0 : vector<16x16x128xbf16> to vector<256x128xbf16>
    %c0_2 = arith.constant 0 : index
    %c0_3 = arith.constant 0 : index
    %c0_4 = arith.constant 0 : index
    %2 = vector.load %arg2[%c0_2, %c0_3, %c0_4] : memref<16x16x128xbf16, #tpu.memory_space<vmem>>, vector<16x16x128xbf16>
    %3 = vector.shape_cast %2 : vector<16x16x128xbf16> to vector<256x128xbf16>
    %4 = tpu.concatenate %1, %3 in 1 : vector<256x128xbf16>, vector<256x128xbf16> -> vector<256x256xbf16>
    %c0_5 = arith.constant 0 : index
    %c0_6 = arith.constant 0 : index
    %c0_7 = arith.constant 0 : index
    %5 = vector.load %arg3[%c0_5, %c0_6, %c0_7] : memref<5x256x128xbf16, #tpu.memory_space<vmem>>, vector<1x256x128xbf16>
    %6 = vector.shape_cast %5 : vector<1x256x128xbf16> to vector<256x128xbf16>
    %cst = arith.constant dense<0.000000e+00> : vector<256x128xf32>
    %7 = tpu.matmul %4, %6, %cst {dimension_numbers = #tpu.dot_dimension_numbers<[1], [0], [0], [1], [0, 0, 1, 1], [], []>} : vector<256x256xbf16>, vector<256x128xbf16>, vector<256x128xf32> -> vector<256x128xf32>
    %c1 = arith.constant 1 : index
    %c0_8 = arith.constant 0 : index
    %c0_9 = arith.constant 0 : index
    %8 = vector.load %arg3[%c1, %c0_8, %c0_9] : memref<5x256x128xbf16, #tpu.memory_space<vmem>>, vector<1x256x128xbf16>
    %9 = vector.shape_cast %8 : vector<1x256x128xbf16> to vector<256x128xbf16>
    %cst_10 = arith.constant dense<0.000000e+00> : vector<256x128xf32>
    %10 = tpu.matmul %4, %9, %cst_10 {dimension_numbers = #tpu.dot_dimension_numbers<[1], [0], [0], [1], [0, 0, 1, 1], [], []>} : vector<256x256xbf16>, vector<256x128xbf16>, vector<256x128xf32> -> vector<256x128xf32>
    %c255_i32 = arith.constant 255 : i32
    %11 = tpu.dynamic_rotate %10 by %c255_i32 dim 0 : vector<256x128xf32>, i32 -> vector<256x128xf32>
    %12 = arith.addf %7, %11 : vector<256x128xf32>
    %c2 = arith.constant 2 : index
    %c0_11 = arith.constant 0 : index
    %c0_12 = arith.constant 0 : index
    %13 = vector.load %arg3[%c2, %c0_11, %c0_12] : memref<5x256x128xbf16, #tpu.memory_space<vmem>>, vector<1x256x128xbf16>
    %14 = vector.shape_cast %13 : vector<1x256x128xbf16> to vector<256x128xbf16>
    %cst_13 = arith.constant dense<0.000000e+00> : vector<256x128xf32>
    %15 = tpu.matmul %4, %14, %cst_13 {dimension_numbers = #tpu.dot_dimension_numbers<[1], [0], [0], [1], [0, 0, 1, 1], [], []>} : vector<256x256xbf16>, vector<256x128xbf16>, vector<256x128xf32> -> vector<256x128xf32>
    %c254_i32 = arith.constant 254 : i32
    %16 = tpu.dynamic_rotate %15 by %c254_i32 dim 0 : vector<256x128xf32>, i32 -> vector<256x128xf32>
    %17 = arith.addf %12, %16 : vector<256x128xf32>
    %c3 = arith.constant 3 : index
    %c0_14 = arith.constant 0 : index
    %c0_15 = arith.constant 0 : index
    %18 = vector.load %arg3[%c3, %c0_14, %c0_15] : memref<5x256x128xbf16, #tpu.memory_space<vmem>>, vector<1x256x128xbf16>
    %19 = vector.shape_cast %18 : vector<1x256x128xbf16> to vector<256x128xbf16>
    %cst_16 = arith.constant dense<0.000000e+00> : vector<256x128xf32>
    %20 = tpu.matmul %4, %19, %cst_16 {dimension_numbers = #tpu.dot_dimension_numbers<[1], [0], [0], [1], [0, 0, 1, 1], [], []>} : vector<256x256xbf16>, vector<256x128xbf16>, vector<256x128xf32> -> vector<256x128xf32>
    %c253_i32 = arith.constant 253 : i32
    %21 = tpu.dynamic_rotate %20 by %c253_i32 dim 0 : vector<256x128xf32>, i32 -> vector<256x128xf32>
    %22 = arith.addf %17, %21 : vector<256x128xf32>
    %c4 = arith.constant 4 : index
    %c0_17 = arith.constant 0 : index
    %c0_18 = arith.constant 0 : index
    %23 = vector.load %arg3[%c4, %c0_17, %c0_18] : memref<5x256x128xbf16, #tpu.memory_space<vmem>>, vector<1x256x128xbf16>
    %24 = vector.shape_cast %23 : vector<1x256x128xbf16> to vector<256x128xbf16>
    %cst_19 = arith.constant dense<0.000000e+00> : vector<256x128xf32>
    %25 = tpu.matmul %4, %24, %cst_19 {dimension_numbers = #tpu.dot_dimension_numbers<[1], [0], [0], [1], [0, 0, 1, 1], [], []>} : vector<256x256xbf16>, vector<256x128xbf16>, vector<256x128xf32> -> vector<256x128xf32>
    %c252_i32 = arith.constant 252 : i32
    %26 = tpu.dynamic_rotate %25 by %c252_i32 dim 0 : vector<256x128xf32>, i32 -> vector<256x128xf32>
    %27 = arith.addf %22, %26 : vector<256x128xf32>
    %c0_20 = arith.constant 0 : index
    %c0_21 = arith.constant 0 : index
    %28 = vector.load %arg4[%c0_20, %c0_21] : memref<1x128xf32, #tpu.memory_space<vmem>>, vector<1x128xf32>
    %29 = vector.broadcast %28 : vector<1x128xf32> to vector<256x128xf32>
    %30 = arith.addf %27, %29 : vector<256x128xf32>
    %cst_22 = arith.constant 0.000000e+00 : f32
    %31 = vector.broadcast %cst_22 : f32 to vector<256x128xf32>
    %32 = arith.maximumf %30, %31 : vector<256x128xf32>
    %33 = vector.shape_cast %32 : vector<256x128xf32> to vector<16x16x128xf32>
    %c0_23 = arith.constant 0 : index
    %c0_24 = arith.constant 0 : index
    %c0_25 = arith.constant 0 : index
    %34 = vector.load %arg5[%c0_23, %c0_24, %c0_25] : memref<1x16x128xf32, #tpu.memory_space<vmem>>, vector<1x16x128xf32>
    %35 = vector.broadcast %34 : vector<1x16x128xf32> to vector<16x16x128xf32>
    %36 = arith.mulf %33, %35 : vector<16x16x128xf32>
    %cst_26 = arith.constant dense<0xFF800000> : vector<16x128xf32>
    %37 = vector.multi_reduction <maximumf>, %36, %cst_26 [1] : vector<16x16x128xf32> to vector<16x128xf32>
    %38 = arith.truncf %37 : vector<16x128xf32> to vector<16x128xbf16>
    %c0_27 = arith.constant 0 : index
    %c0_28 = arith.constant 0 : index
    %39 = vector.load %arg6[%c0_27, %c0_28] : memref<128x128xbf16, #tpu.memory_space<vmem>>, vector<128x128xbf16>
    %cst_29 = arith.constant dense<0.000000e+00> : vector<16x128xf32>
    %40 = tpu.matmul %38, %39, %cst_29 {dimension_numbers = #tpu.dot_dimension_numbers<[1], [0], [0], [1], [0, 0, 1, 1], [], []>} : vector<16x128xbf16>, vector<128x128xbf16>, vector<16x128xf32> -> vector<16x128xf32>
    %c0_30 = arith.constant 0 : index
    %c0_31 = arith.constant 0 : index
    %41 = vector.load %arg7[%c0_30, %c0_31] : memref<1x128xf32, #tpu.memory_space<vmem>>, vector<1x128xf32>
    %42 = vector.broadcast %41 : vector<1x128xf32> to vector<16x128xf32>
    %43 = arith.addf %40, %42 : vector<16x128xf32>
    %c0_32 = arith.constant 0 : index
    %c0_33 = arith.constant 0 : index
    %44 = vector.load %arg8[%c0_32, %c0_33] : memref<16x128xf32, #tpu.memory_space<vmem>>, vector<16x128xf32>
    tpu.vector_store %arg8[%c0_32, %c0_33], %43 {strides = array<i32>} : memref<16x128xf32, #tpu.memory_space<vmem>>, vector<16x128xf32>,
    return
  }
  func.func @transform_0(%arg0: i32) -> (i32, i32, i32) {
    %c0_i32 = arith.constant 0 : i32
    %c0_i32_0 = arith.constant 0 : i32
    %c0_i32_1 = arith.constant 0 : i32
    return %arg0, %c0_i32, %c0_i32_0 : i32, i32, i32
  }
  func.func @transform_1(%arg0: i32) -> (i32, i32, i32) {
    %c0_i32 = arith.constant 0 : i32
    %c0_i32_0 = arith.constant 0 : i32
    %c0_i32_1 = arith.constant 0 : i32
    return %arg0, %c0_i32, %c0_i32_0 : i32, i32, i32
  }
  func.func @transform_2(%arg0: i32) -> (i32, i32, i32) {
    %c0_i32 = arith.constant 0 : i32
    %c0_i32_0 = arith.constant 0 : i32
    %c0_i32_1 = arith.constant 0 : i32
    %c0_i32_2 = arith.constant 0 : i32
    return %c0_i32, %c0_i32_0, %c0_i32_1 : i32, i32, i32
  }
  func.func @transform_3(%arg0: i32) -> (i32, i32) {
    %c0_i32 = arith.constant 0 : i32
    %c0_i32_0 = arith.constant 0 : i32
    %c0_i32_1 = arith.constant 0 : i32
    return %c0_i32, %c0_i32_0 : i32, i32
  }
  func.func @transform_4(%arg0: i32) -> (i32, i32, i32) {
    %c0_i32 = arith.constant 0 : i32
    %c0_i32_0 = arith.constant 0 : i32
    %c0_i32_1 = arith.constant 0 : i32
    %c0_i32_2 = arith.constant 0 : i32
    return %c0_i32, %c0_i32_0, %c0_i32_1 : i32, i32, i32
  }
  func.func @transform_5(%arg0: i32) -> (i32, i32) {
    %c0_i32 = arith.constant 0 : i32
    %c0_i32_0 = arith.constant 0 : i32
    %c0_i32_1 = arith.constant 0 : i32
    return %c0_i32, %c0_i32_0 : i32, i32
  }
  func.func @transform_6(%arg0: i32) -> (i32, i32) {
    %c0_i32 = arith.constant 0 : i32
    %c0_i32_0 = arith.constant 0 : i32
    %c0_i32_1 = arith.constant 0 : i32
    return %c0_i32, %c0_i32_0 : i32, i32
  }
  func.func @transform_7(%arg0: i32) -> (i32, i32) {
    %c0_i32 = arith.constant 0 : i32
    %c0_i32_0 = arith.constant 0 : i32
    return %arg0, %c0_i32 : i32, i32
  }
}

</mosaic_0001>

<bundles_post_ra>
// kernel: forward.1
= control target key start
LH: loop header
LB: loop body
LE: loop exit
PB: predicated region body
PF: predicated region fallthrough
CT: control target
= control target key end

     0   :  { %vm3491_vm4 = vmmov 0   ;;  %vm2378_vm5 = vcmask 1041409   ;;  %vm2380_vm6 = vcmask 1042434   ;;  %vm2382_vm7 = vcmask 1043459   ;;  %s4881_s2 = inlined_call_operand.vmem [shape: bf16[5,256,128], index: 2, kind: input, shape index: {}]   ;;  %s4882_s1 = inlined_call_operand.vmem [shape: bf16[16,16,128], index: 1, kind: input, shape index: {}]   ;;  %s4883_s0 = inlined_call_operand.vmem [shape: bf16[16,16,128], index: 0, kind: input, shape index: {}]   ;;  %s4884_s5 = inlined_call_operand.vmem [shape: bf16[128,128], index: 5, kind: input, shape index: {}]   ;;  %s4885_s3 = inlined_call_operand.vmem [shape: f32[1,128], index: 3, kind: input, shape index: {}]   ;;  %s4886_s4 = inlined_call_operand.vmem [shape: f32[1,16,128], index: 4, kind: input, shape index: {}]   ;;  %s4887_s6 = inlined_call_operand.vmem [shape: f32[1,128], index: 6, kind: input, shape index: {}]   ;;  %s4888_s7 = inlined_call_operand.vmem [shape: f32[16,128], index: 7, kind: output, shape index: {}]  }
   0x1   :  { %v3353_v0 = vld [vmem:[%s4881_s2 + $0xc0] sm:$0xff]   ;;  %v3355_v2 = vld [vmem:[%s4881_s2 + $0xc8] sm:$0xff]   ;;  %v3357_v4 = vld [vmem:[%s4881_s2 + $0xd0] sm:$0xff]   ;;  %vm2384_vm8 = vcmask 1044484   ;;  %vm2386_vm9 = vcmask 1045509   ;;  %vm2388_vm10 = vcmask 1046534  }
   0x2   :  { %v3354_v1 = vld [vmem:[%s4881_s2 + $0x80] sm:$0xff]   ;;  %2746 = vmatprep.subr.bf16.mxu0 %v3353_v0  ;;  %3335 = vmatprep.subr.bf16.mxu1 %v3353_v0  ;;  %v3356_v3 = vld [vmem:[%s4881_s2 + $0x88] sm:$0xff]   ;;  %v3358_v5 = vld [vmem:[%s4881_s2 + $0x90] sm:$0xff]   ;;  %vm2390_vm11 = vcmask 1047559  }
   0x3   :  { %2747 = vmatpush3.bf16.msra.mxu0 %v3354_v1  ;;  %3343 = vmatpush3.bf16.msra.mxu1 %v3354_v1  ;;  %v3359_v6 = vld [vmem:[%s4881_s2 + $0xd8] sm:$0xff]   ;;  %v3361_v8 = vld [vmem:[%s4881_s2 + $0xe0] sm:$0xff]   ;;  %v3363_v10 = vld [vmem:[%s4881_s2 + $0xe8] sm:$0xff]  }
   0x4   :  { %2748 = vmatprep.subr.bf16.mxu0 %v3355_v2  ;;  %3336 = vmatprep.subr.bf16.mxu1 %v3355_v2  ;;  %v3360_v7 = vld [vmem:[%s4881_s2 + $0x98] sm:$0xff]   ;;  %v3362_v9 = vld [vmem:[%s4881_s2 + $0xa0] sm:$0xff]   ;;  %v3573_v12 = vld [vmem:[%s4882_s1 + $0x48] sm:$0xff]  }
   0x5   :  { %v3568_v11 = vld [vmem:[%s4882_s1] sm:$0xff]   ;;  %v3364_v13 = vld [vmem:[%s4881_s2 + $0xa8] sm:$0xff]   ;;  %v3365_v14 = vld [vmem:[%s4881_s2 + $0xf0] sm:$0xff]   ;;  %548 = vmatprep.mubr.bf16.mxu1 %v3573_v12 }
   0x6   :  { %476 = vmatprep.mubr.bf16.mxu0 %v3568_v11  ;;  %v3366_v15 = vld [vmem:[%s4881_s2 + $0xb0] sm:$0xff]   ;;  %v3367_v16 = vld [vmem:[%s4881_s2 + $0xf8] sm:$0xff]   ;;  %v3373_v18 = vld [vmem:[%s4881_s2 + $0x140] sm:$0xff]  }
   0x7   :  { %2749 = vmatpush3.bf16.msra.mxu0 %v3356_v3  ;;  %3344 = vmatpush3.bf16.msra.mxu1 %v3356_v3  ;;  %v3368_v17 = vld [vmem:[%s4881_s2 + $0xb8] sm:$0xff]   ;;  %v3598_v19 = vld [vmem:[%s4883_s0] sm:$0xff]   ;;  %v3603_v20 = vld [vmem:[%s4883_s0 + $0x48] sm:$0xff]  }
   0x8   :  { %2750 = vmatprep.subr.bf16.mxu0 %v3357_v4  ;;  %3337 = vmatprep.subr.bf16.mxu1 %v3357_v4  ;;  %v3381_v21 = vld [vmem:[%s4881_s2 + $0x40] sm:$0xff]   ;;  %v3614_v23 = vld [vmem:[%s4882_s1 + $0x8] sm:$0xff]   ;;  %v3619_v24 = vld [vmem:[%s4882_s1 + $0x50] sm:$0xff]  }
   0x9   :  { %v3374_v22 = vld [vmem:[%s4881_s2 + $0x100] sm:$0xff]   ;;  %v3379_v25 = vld [vmem:[%s4881_s2 + $0x148] sm:$0xff]   ;;  %v3387_v28 = vld [vmem:[%s4881_s2 + $0x150] sm:$0xff]  }
   0xa   :  { %v3384_v26 = vld [vmem:[%s4881_s2] sm:$0xff]   ;;  %v3380_v27 = vld [vmem:[%s4881_s2 + $0x108] sm:$0xff]   ;;  %v3645_v30 = vld [vmem:[%s4883_s0 + $0x50] sm:$0xff]  }
   0xb   :  { %2751 = vmatpush3.bf16.msra.mxu0 %v3358_v5  ;;  %3345 = vmatpush3.bf16.msra.mxu1 %v3358_v5  ;;  %v3640_v29 = vld [vmem:[%s4883_s0 + $0x8] sm:$0xff]   ;;  %v3656_v33 = vld [vmem:[%s4882_s1 + $0x10] sm:$0xff]   ;;  %v3661_v34 = vld [vmem:[%s4882_s1 + $0x58] sm:$0xff]  }
   0xc   :  { %2752 = vmatprep.subr.bf16.mxu0 %v3359_v6  ;;  %3338 = vmatprep.subr.bf16.mxu1 %v3359_v6  ;;  %v3389_v31 = vld [vmem:[%s4881_s2 + $0x48] sm:$0xff]   ;;  %v3388_v35 = vld [vmem:[%s4881_s2 + $0x110] sm:$0xff]   ;;  %v3395_v36 = vld [vmem:[%s4881_s2 + $0x158] sm:$0xff]  }
   0xd   :  { %v3390_v32 = vld [vmem:[%s4881_s2 + $0x8] sm:$0xff]   ;;  %v3396_v37 = vld [vmem:[%s4881_s2 + $0x50] sm:$0xff]   ;;  %v3684_v39 = vld [vmem:[%s4883_s0 + $0x58] sm:$0xff]  }
   0xe   :  { %v3679_v38 = vld [vmem:[%s4883_s0 + $0x10] sm:$0xff]   ;;  %v3397_v40 = vld [vmem:[%s4881_s2 + $0x118] sm:$0xff]   ;;  %v3700_v43 = vld [vmem:[%s4882_s1 + $0x60] sm:$0xff]  }
   0xf   :  { %2753 = vmatpush3.bf16.msra.mxu0 %v3360_v7  ;;  %3346 = vmatpush3.bf16.msra.mxu1 %v3360_v7  ;;  %v3398_v41 = vld [vmem:[%s4881_s2 + $0x10] sm:$0xff]   ;;  %v3695_v42 = vld [vmem:[%s4882_s1 + $0x18] sm:$0xff]   ;;  %v3720_v47 = vld [vmem:[%s4883_s0 + $0x60] sm:$0xff]  }
  0x10   :  { %2754 = vmatprep.subr.bf16.mxu0 %v3361_v8  ;;  %3339 = vmatprep.subr.bf16.mxu1 %v3361_v8  ;;  %v3403_v44 = vld [vmem:[%s4881_s2 + $0x58] sm:$0xff]   ;;  %v3405_v48 = vld [vmem:[%s4881_s2 + $0x160] sm:$0xff]   ;;  %v3736_v51 = vld [vmem:[%s4882_s1 + $0x68] sm:$0xff]  }
  0x11   :  { %v3404_v45 = vld [vmem:[%s4881_s2 + $0x18] sm:$0xff]   ;;  %v3406_v49 = vld [vmem:[%s4881_s2 + $0x120] sm:$0xff]   ;;  %v3756_v55 = vld [vmem:[%s4883_s0 + $0x68] sm:$0xff]  }
  0x12   :  { %v3715_v46 = vld [vmem:[%s4883_s0 + $0x18] sm:$0xff]   ;;  %v3731_v50 = vld [vmem:[%s4882_s1 + $0x20] sm:$0xff]   ;;  %v3413_v56 = vld [vmem:[%s4881_s2 + $0x68] sm:$0xff]  }
  0x13   :  { %2755 = vmatpush3.bf16.msra.mxu0 %v3362_v9  ;;  %3347 = vmatpush3.bf16.msra.mxu1 %v3362_v9  ;;  %v3411_v52 = vld [vmem:[%s4881_s2 + $0x60] sm:$0xff]   ;;  %v3764_v57 = vld [vmem:[%s4882_s1 + $0x28] sm:$0xff]   ;;  %v3769_v58 = vld [vmem:[%s4882_s1 + $0x70] sm:$0xff]  }
  0x14   :  { %2756 = vmatprep.subr.bf16.mxu0 %v3363_v10  ;;  %3340 = vmatprep.subr.bf16.mxu1 %v3363_v10  ;;  %v3412_v53 = vld [vmem:[%s4881_s2 + $0x20] sm:$0xff]   ;;  %v3414_v59 = vld [vmem:[%s4881_s2 + $0x28] sm:$0xff]   ;;  %v3792_v63 = vld [vmem:[%s4883_s0 + $0x70] sm:$0xff]  }
  0x15   :  { %v3751_v54 = vld [vmem:[%s4883_s0 + $0x20] sm:$0xff]   ;;  %v3415_v60 = vld [vmem:[%s4881_s2 + $0x168] sm:$0xff]   ;;  %v3421_v0 = vld [vmem:[%s4881_s2 + $0x70] sm:$0xff]  }
  0x16   :  { %v3416_v61 = vld [vmem:[%s4881_s2 + $0x128] sm:$0xff]   ;;  %v3800_v1 = vld [vmem:[%s4882_s1 + $0x30] sm:$0xff]   ;;  %v3805_v2 = vld [vmem:[%s4882_s1 + $0x78] sm:$0xff]  }
  0x17   :  { %2757 = vmatpush3.bf16.msra.mxu0 %v3364_v13  ;;  %3348 = vmatpush3.bf16.msra.mxu1 %v3364_v13  ;;  %v3787_v62 = vld [vmem:[%s4883_s0 + $0x28] sm:$0xff]   ;;  %v3422_v3 = vld [vmem:[%s4881_s2 + $0x30] sm:$0xff]   ;;  %v3423_v4 = vld [vmem:[%s4881_s2 + $0x78] sm:$0xff]  }
  0x18   :  { %2758 = vmatprep.subr.bf16.mxu0 %v3365_v14  ;;  %3341 = vmatprep.subr.bf16.mxu1 %v3365_v14  ;;  %v3424_v5 = vld [vmem:[%s4881_s2 + $0x38] sm:$0xff]   ;;  %v3425_v6 = vld [vmem:[%s4881_s2 + $0x170] sm:$0xff]  }
  0x19   :  { %v3427_v7 = vld [vmem:[%s4881_s2 + $0x130] sm:$0xff]   ;;  %v3834_v9 = vld [vmem:[%s4883_s0 + $0x78] sm:$0xff]  }
  0x1a   :  { %v3829_v8 = vld [vmem:[%s4883_s0 + $0x30] sm:$0xff]   ;;  %v3430_v10 = vld [vmem:[%s4881_s2 + $0x178] sm:$0xff]  }
  0x1b   :  { %2759 = vmatpush3.bf16.msra.mxu0 %v3366_v15  ;;  %3349 = vmatpush3.bf16.msra.mxu1 %v3366_v15  ;;  %v3842_v13 = vld [vmem:[%s4882_s1 + $0x38] sm:$0xff]   ;;  %v3433_v15 = vld [vmem:[%s4881_s2 + $0x1c0] sm:$0xff]  }
  0x1c   :  { %2760 = vmatprep.subr.bf16.mxu0 %v3367_v16  ;;  %3342 = vmatprep.subr.bf16.mxu1 %v3367_v16  ;;  %v3432_v14 = vld [vmem:[%s4881_s2 + $0x138] sm:$0xff]   ;;  %v3435_v16 = vld [vmem:[%s4881_s2 + $0x240] sm:$0xff]  }
  0x1f   :  { %2761 = vmatpush3.bf16.msra.mxu0 %v3368_v17  ;;  %3350 = vmatpush3.bf16.msra.mxu1 %v3368_v17  ;;  %v3860_v17 = vld [vmem:[%s4883_s0 + $0x38] sm:$0xff]  }
  0x20   :  { %2970 = vmatprep.subr.bf16.mxu0 %v3373_v18  ;;  %2858 = vmatprep.subr.bf16.mxu1 %v3381_v21  ;;  %v3865_v18 = vld [vmem:[%s4882_s1 + $0x40] sm:$0xff]  }
  0x21   :  { %v3434_v21 = vld [vmem:[%s4881_s2 + $0x180] sm:$0xff]  }
  0x22   :  { %477 = vmatmul.mubr.bf16.vlgmr.msra.gmra.mrb[0].mxu0 %v3598_v19  ;;  %549 = vmatmul.mubr.bf16.vlgmr.msra.gmra.mrb[0].mxu1 %v3603_v20 }
  0x23   :  { %2971 = vmatpush3.bf16.msra.mxu0 %v3374_v22  ;;  %484 = vmatprep.mubr.bf16.mxu0 %v3614_v23  ;;  %v3437_v22 = vld [vmem:[%s4881_s2 + $0x1c8] sm:$0xff]  }
  0x24   :  { %556 = vmatprep.mubr.bf16.mxu1 %v3619_v24  ;;  %2972 = vmatprep.subr.bf16.mxu0 %v3379_v25  ;;  %v3438_v25 = vld [vmem:[%s4881_s2 + $0x188] sm:$0xff]  }
  0x25   :  { %2859 = vmatpush3.bf16.msra.mxu1 %v3384_v26  ;;  %v3441_v26 = vld [vmem:[%s4881_s2 + $0x1d0] sm:$0xff]  }
  0x26   :  { %2860 = vmatprep.subr.bf16.mxu1 %v3389_v31  ;;  %v3445_v31 = vld [vmem:[%s4881_s2 + $0x1d8] sm:$0xff]  }
  0x27   :  { %2973 = vmatpush3.bf16.msra.mxu0 %v3380_v27  ;;  %v3886_v27 = vld [vmem:[%s4883_s0 + $0x40] sm:$0xff]  }
  0x28   :  { %2974 = vmatprep.subr.bf16.mxu0 %v3387_v28  ;;  %v3442_v28 = vld [vmem:[%s4881_s2 + $0x190] sm:$0xff]  }
  0x29   :  { %2861 = vmatpush3.bf16.msra.mxu1 %v3390_v32  ;;  %v3446_v32 = vld [vmem:[%s4881_s2 + $0x198] sm:$0xff]  }
  0x2a   :  { %485 = vmatmul.mubr.bf16.gmra.mrb[4].mxu0 %v3640_v29  ;;  %557 = vmatmul.mubr.bf16.gmra.mrb[4].mxu1 %v3645_v30 }
  0x2b   :  { %492 = vmatprep.mubr.bf16.mxu0 %v3656_v33  ;;  %564 = vmatprep.mubr.bf16.mxu1 %v3661_v34 }
  0x2c   :  { %2975 = vmatpush3.bf16.msra.mxu0 %v3388_v35  ;;  %2862 = vmatprep.subr.bf16.mxu1 %v3396_v37  ;;  %v3449_v35 = vld [vmem:[%s4881_s2 + $0x1e0] sm:$0xff]   ;;  %v3439_v37 = vld [vmem:[%s4881_s2 + $0x248] sm:$0xff]  }
  0x2d   :  { %2976 = vmatprep.subr.bf16.mxu0 %v3395_v36  ;;  %2863 = vmatpush3.bf16.msra.mxu1 %v3398_v41  ;;  %v3436_v36 = vld [vmem:[%s4881_s2 + $0x200] sm:$0xff]   ;;  %v3453_v41 = vld [vmem:[%s4881_s2 + $0x1e8] sm:$0xff]  }
  0x2e   :  { %2864 = vmatprep.subr.bf16.mxu1 %v3403_v44  ;;  %v3440_v44 = vld [vmem:[%s4881_s2 + $0x208] sm:$0xff]  }
  0x30   :  { %2977 = vmatpush3.bf16.msra.mxu0 %v3397_v40  ;;  %v3450_v40 = vld [vmem:[%s4881_s2 + $0x1a0] sm:$0xff]  }
  0x31   :  { %2865 = vmatpush3.bf16.msra.mxu1 %v3404_v45  ;;  %2978 = vmatprep.subr.bf16.mxu0 %v3405_v48  ;;  %v3443_v45 = vld [vmem:[%s4881_s2 + $0x250] sm:$0xff]   ;;  %v3454_v48 = vld [vmem:[%s4881_s2 + $0x1a8] sm:$0xff]  }
  0x32   :  { %493 = vmatmul.mubr.bf16.gmra.mrb[8].mxu0 %v3679_v38  ;;  %565 = vmatmul.mubr.bf16.gmra.mrb[8].mxu1 %v3684_v39 }
  0x33   :  { %500 = vmatprep.mubr.bf16.mxu0 %v3695_v42  ;;  %572 = vmatprep.mubr.bf16.mxu1 %v3700_v43 }
  0x34   :  { %2979 = vmatpush3.bf16.msra.mxu0 %v3406_v49  ;;  %2866 = vmatprep.subr.bf16.mxu1 %v3411_v52  ;;  %v3444_v49 = vld [vmem:[%s4881_s2 + $0x210] sm:$0xff]  }
  0x35   :  { %2867 = vmatpush3.bf16.msra.mxu1 %v3412_v53  ;;  %2980 = vmatprep.subr.bf16.mxu0 %v3415_v60  ;;  %v3457_v52 = vld [vmem:[%s4881_s2 + $0x1f0] sm:$0xff]   ;;  %v3447_v53 = vld [vmem:[%s4881_s2 + $0x258] sm:$0xff]  }
  0x36   :  { %2868 = vmatprep.subr.bf16.mxu1 %v3413_v56  ;;  %v3458_v56 = vld [vmem:[%s4881_s2 + $0x1b0] sm:$0xff]   ;;  %v3448_v60 = vld [vmem:[%s4881_s2 + $0x218] sm:$0xff]  }
  0x38   :  { %2981 = vmatpush3.bf16.msra.mxu0 %v3416_v61  ;;  %v3451_v61 = vld [vmem:[%s4881_s2 + $0x260] sm:$0xff]  }
  0x39   :  { %2869 = vmatpush3.bf16.msra.mxu1 %v3414_v59  ;;  %2982 = vmatprep.subr.bf16.mxu0 %v3425_v6  ;;  %v3461_v59 = vld [vmem:[%s4881_s2 + $0x1f8] sm:$0xff]   ;;  %v3459_v6 = vld [vmem:[%s4881_s2 + $0x270] sm:$0xff]  }
  0x3a   :  { %501 = vmatmul.mubr.bf16.gmra.mrb[12].mxu0 %v3715_v46  ;;  %573 = vmatmul.mubr.bf16.gmra.mrb[12].mxu1 %v3720_v47 }
  0x3b   :  { %508 = vmatprep.mubr.bf16.mxu0 %v3731_v50  ;;  %580 = vmatprep.mubr.bf16.mxu1 %v3736_v51 }
  0x3c   :  { %2870 = vmatprep.subr.bf16.mxu1 %v3421_v0  ;;  %2983 = vmatpush3.bf16.msra.mxu0 %v3427_v7  ;;  %v3462_v0 = vld [vmem:[%s4881_s2 + $0x1b8] sm:$0xff]   ;;  %v3460_v7 = vld [vmem:[%s4881_s2 + $0x230] sm:$0xff]  }
  0x3d   :  { %2871 = vmatpush3.bf16.msra.mxu1 %v3422_v3  ;;  %2984 = vmatprep.subr.bf16.mxu0 %v3430_v10  ;;  %v3452_v3 = vld [vmem:[%s4881_s2 + $0x220] sm:$0xff]   ;;  %v3463_v10 = vld [vmem:[%s4881_s2 + $0x278] sm:$0xff]  }
  0x3e   :  { %2872 = vmatprep.subr.bf16.mxu1 %v3423_v4  ;;  %v3455_v4 = vld [vmem:[%s4881_s2 + $0x268] sm:$0xff]  }
  0x40   :  { %2985 = vmatpush3.bf16.msra.mxu0 %v3432_v14  ;;  %v3464_v14 = vld [vmem:[%s4881_s2 + $0x238] sm:$0xff]  }
  0x41   :  { %2873 = vmatpush3.bf16.msra.mxu1 %v3424_v5  ;;  %3194 = vmatprep.subr.bf16.mxu0 %v3435_v16  ;;  %v3456_v5 = vld [vmem:[%s4881_s2 + $0x228] sm:$0xff]  }
  0x42   :  { %509 = vmatmul.mubr.bf16.gmra.mrb[16].mxu0 %v3751_v54  ;;  %581 = vmatmul.mubr.bf16.gmra.mrb[16].mxu1 %v3756_v55 }
  0x43   :  { %516 = vmatprep.mubr.bf16.mxu0 %v3764_v57  ;;  %588 = vmatprep.mubr.bf16.mxu1 %v3769_v58 }
  0x44   :  { %3082 = vmatprep.subr.bf16.mxu1 %v3433_v15 }
  0x4a   :  { %517 = vmatmul.mubr.bf16.gmra.mrb[20].mxu0 %v3787_v62  ;;  %589 = vmatmul.mubr.bf16.gmra.mrb[20].mxu1 %v3792_v63 }
  0x4b   :  { %524 = vmatprep.mubr.bf16.mxu0 %v3800_v1  ;;  %596 = vmatprep.mubr.bf16.mxu1 %v3805_v2 }
  0x52   :  { %525 = vmatmul.mubr.bf16.gmra.mrb[24].mxu0 %v3829_v8  ;;  %597 = vmatmul.mubr.bf16.gmra.mrb[24].mxu1 %v3834_v9 }
  0x53   :  { %532 = vmatprep.mubr.bf16.mxu0 %v3842_v13  ;;  %800 = vmatprep.mubr.bf16.mxu1 %v3568_v11 }
  0x5a   :  { %533 = vmatmul.mubr.bf16.gmra.mrb[28].mxu0 %v3860_v17  ;;  %801 = vmatmul.mubr.bf16.vlgmr.msra.gmra.mrb[28].mxu1 %v3598_v19 }
  0x5b   :  { %540 = vmatprep.mubr.bf16.mxu0 %v3865_v18  ;;  %808 = vmatprep.mubr.bf16.mxu1 %v3614_v23 }
  0x5c   :  { %3083 = vmatpush3.bf16.msra.mxu1 %v3434_v21 }
  0x5d   :  { %3084 = vmatprep.subr.bf16.mxu1 %v3437_v22 }
  0x60   :  { %3085 = vmatpush3.bf16.msra.mxu1 %v3438_v25 }
  0x61   :  { %3086 = vmatprep.subr.bf16.mxu1 %v3441_v26 }
  0x62   :  { %541 = vmatmul.mubr.bf16.gmra.mrb[32].mxu0 %v3886_v27  ;;  %809 = vmatmul.mubr.bf16.gmra.mrb[32].mxu1 %v3640_v29 }
  0x63   :  { %816 = vmatprep.mubr.bf16.mxu1 %v3656_v33  ;;  %1090 = vmatprep.mubr.bf16.mxu0 %v3568_v11 }
  0x64   :  { %3087 = vmatpush3.bf16.msra.mxu1 %v3442_v28 }
  0x65   :  { %3088 = vmatprep.subr.bf16.mxu1 %v3445_v31 }
  0x68   :  { %3089 = vmatpush3.bf16.msra.mxu1 %v3446_v32 }
  0x69   :  { %3090 = vmatprep.subr.bf16.mxu1 %v3449_v35 }
  0x6a   :  { %817 = vmatmul.mubr.bf16.gmra.mrb[36].mxu1 %v3679_v38  ;;  %1091 = vmatmul.mubr.bf16.vlgmr.msra.gmra.mrb[36].mxu0 %v3598_v19 }
  0x6b   :  { %3195 = vmatpush3.bf16.msra.mxu0 %v3436_v36  ;;  %824 = vmatprep.mubr.bf16.mxu1 %v3695_v42 }
  0x6c   :  { %1098 = vmatprep.mubr.bf16.mxu0 %v3614_v23  ;;  %3196 = vmatprep.subr.bf16.mxu0 %v3439_v37 }
  0x6d   :  { %3091 = vmatpush3.bf16.msra.mxu1 %v3450_v40 }
  0x6e   :  { %3092 = vmatprep.subr.bf16.mxu1 %v3453_v41 }
  0x6f   :  { %3197 = vmatpush3.bf16.msra.mxu0 %v3440_v44 }
  0x70   :  { %3198 = vmatprep.subr.bf16.mxu0 %v3443_v45 }
  0x71   :  { %3093 = vmatpush3.bf16.msra.mxu1 %v3454_v48 }
  0x72   :  { %825 = vmatmul.mubr.bf16.gmra.mrb[40].mxu1 %v3715_v46  ;;  %1099 = vmatmul.mubr.bf16.gmra.mrb[40].mxu0 %v3640_v29 }
  0x73   :  { %832 = vmatprep.mubr.bf16.mxu1 %v3731_v50  ;;  %1106 = vmatprep.mubr.bf16.mxu0 %v3656_v33 }
  0x74   :  { %3199 = vmatpush3.bf16.msra.mxu0 %v3444_v49  ;;  %3094 = vmatprep.subr.bf16.mxu1 %v3457_v52 }
  0x75   :  { %3200 = vmatprep.subr.bf16.mxu0 %v3447_v53  ;;  %3095 = vmatpush3.bf16.msra.mxu1 %v3458_v56 }
  0x76   :  { %3096 = vmatprep.subr.bf16.mxu1 %v3461_v59 }
  0x78   :  { %3201 = vmatpush3.bf16.msra.mxu0 %v3448_v60 }
  0x79   :  { %3202 = vmatprep.subr.bf16.mxu0 %v3451_v61  ;;  %3097 = vmatpush3.bf16.msra.mxu1 %v3462_v0 }
  0x7a   :  { %833 = vmatmul.mubr.bf16.gmra.mrb[44].mxu1 %v3751_v54  ;;  %1107 = vmatmul.mubr.bf16.gmra.mrb[44].mxu0 %v3679_v38 }
  0x7b   :  { %840 = vmatprep.mubr.bf16.mxu1 %v3764_v57  ;;  %1114 = vmatprep.mubr.bf16.mxu0 %v3695_v42 }
  0x7c   :  { %3203 = vmatpush3.bf16.msra.mxu0 %v3452_v3 }
  0x7d   :  { %3204 = vmatprep.subr.bf16.mxu0 %v3455_v4 }
  0x80   :  { %3205 = vmatpush3.bf16.msra.mxu0 %v3456_v5 }
  0x81   :  { %3206 = vmatprep.subr.bf16.mxu0 %v3459_v6 }
  0x82   :  { %841 = vmatmul.mubr.bf16.gmra.mrb[48].mxu1 %v3787_v62  ;;  %1115 = vmatmul.mubr.bf16.gmra.mrb[48].mxu0 %v3715_v46 }
  0x83   :  { %848 = vmatprep.mubr.bf16.mxu1 %v3800_v1  ;;  %1122 = vmatprep.mubr.bf16.mxu0 %v3731_v50 }
  0x84   :  { %3207 = vmatpush3.bf16.msra.mxu0 %v3460_v7 }
  0x85   :  { %3208 = vmatprep.subr.bf16.mxu0 %v3463_v10 }
  0x88   :  { %3209 = vmatpush3.bf16.msra.mxu0 %v3464_v14 }
  0x8a   :  { %849 = vmatmul.mubr.bf16.gmra.mrb[52].mxu1 %v3829_v8  ;;  %1123 = vmatmul.mubr.bf16.gmra.mrb[52].mxu0 %v3751_v54 }
  0x8b   :  { %856 = vmatprep.mubr.bf16.mxu1 %v3842_v13  ;;  %1130 = vmatprep.mubr.bf16.mxu0 %v3764_v57 }
  0x92   :  { %857 = vmatmul.mubr.bf16.gmra.mrb[56].mxu1 %v3860_v17  ;;  %1131 = vmatmul.mubr.bf16.gmra.mrb[56].mxu0 %v3787_v62 }
  0x93   :  { %864 = vmatprep.mubr.bf16.mxu1 %v3865_v18  ;;  %1138 = vmatprep.mubr.bf16.mxu0 %v3800_v1 }
  0x9a   :  { %865 = vmatmul.mubr.bf16.gmra.mrb[60].mxu1 %v3886_v27  ;;  %1139 = vmatmul.mubr.bf16.gmra.mrb[60].mxu0 %v3829_v8 }
  0x9b   :  { %872 = vmatprep.mubr.bf16.mxu1 %v3573_v12  ;;  %1146 = vmatprep.mubr.bf16.mxu0 %v3842_v13 }
  0xa2   :  { %873 = vmatmul.mubr.bf16.gmra.mrb[64].mxu1 %v3603_v20  ;;  %1147 = vmatmul.mubr.bf16.gmra.mrb[64].mxu0 %v3860_v17 }
  0xa3   :  { %880 = vmatprep.mubr.bf16.mxu1 %v3619_v24  ;;  %1154 = vmatprep.mubr.bf16.mxu0 %v3865_v18 }
  0xaa   :  { %881 = vmatmul.mubr.bf16.gmra.mrb[68].mxu1 %v3645_v30  ;;  %1155 = vmatmul.mubr.bf16.gmra.mrb[68].mxu0 %v3886_v27 }
  0xab   :  { %888 = vmatprep.mubr.bf16.mxu1 %v3661_v34  ;;  %1162 = vmatprep.mubr.bf16.mxu0 %v3573_v12  ;;  %v637_v12 = vlaneseq }
  0xb2   :  { %889 = vmatmul.mubr.bf16.gmra.mrb[72].mxu1 %v3684_v39  ;;  %1163 = vmatmul.mubr.bf16.gmra.mrb[72].mxu0 %v3603_v20 }
  0xb3   :  { %896 = vmatprep.mubr.bf16.mxu1 %v3700_v43  ;;  %1170 = vmatprep.mubr.bf16.mxu0 %v3619_v24 }
  0xba   :  { %897 = vmatmul.mubr.bf16.gmra.mrb[76].mxu1 %v3720_v47  ;;  %1171 = vmatmul.mubr.bf16.gmra.mrb[76].mxu0 %v3645_v30 }
  0xbb   :  { %904 = vmatprep.mubr.bf16.mxu1 %v3736_v51  ;;  %1178 = vmatprep.mubr.bf16.mxu0 %v3661_v34  ;;  %v4042_v34 = vshrl.u32 %v637_v12, 7 }
  0xbd   :  { %vm639_vm0 = vcmp.lt.s32.totalorder %v4042_v34, 7  ;;  %vm1251_vm1 = vcmp.lt.s32.totalorder %v4042_v34, 6  ;;  %vm1638_vm2 = vcmp.lt.s32.totalorder %v4042_v34, 5  ;;  %vm2025_vm3 = vcmp.lt.s32.totalorder %v4042_v34, 4 }
  0xc2   :  { %905 = vmatmul.mubr.bf16.gmra.mrb[80].mxu1 %v3756_v55  ;;  %1179 = vmatmul.mubr.bf16.gmra.mrb[80].mxu0 %v3684_v39 }
  0xc3   :  { %912 = vmatprep.mubr.bf16.mxu1 %v3769_v58  ;;  %1186 = vmatprep.mubr.bf16.mxu0 %v3700_v43 }
  0xca   :  { %913 = vmatmul.mubr.bf16.gmra.mrb[84].mxu1 %v3792_v63  ;;  %1187 = vmatmul.mubr.bf16.gmra.mrb[84].mxu0 %v3720_v47 }
  0xcb   :  { %920 = vmatprep.mubr.bf16.mxu1 %v3805_v2  ;;  %1194 = vmatprep.mubr.bf16.mxu0 %v3736_v51 }
  0xd2   :  { %921 = vmatmul.mubr.bf16.gmra.mrb[88].mxu1 %v3834_v9  ;;  %1195 = vmatmul.mubr.bf16.gmra.mrb[88].mxu0 %v3756_v55 }
  0xd3   :  { %1202 = vmatprep.mubr.bf16.mxu0 %v3769_v58  ;;  %1477 = vmatprep.mubr.bf16.mxu1 %v3568_v11 }
  0xda   :  { %1203 = vmatmul.mubr.bf16.gmra.mrb[92].mxu0 %v3792_v63  ;;  %1478 = vmatmul.mubr.bf16.vlgmr.msra.gmra.mrb[92].mxu1 %v3598_v19 }
  0xdb   :  { %1210 = vmatprep.mubr.bf16.mxu0 %v3805_v2  ;;  %1485 = vmatprep.mubr.bf16.mxu1 %v3614_v23 }
  0xe2   :  { %1211 = vmatmul.mubr.bf16.gmra.mrb[96].mxu0 %v3834_v9  ;;  %1486 = vmatmul.mubr.bf16.gmra.mrb[96].mxu1 %v3640_v29 }
  0xe3   :  { %1493 = vmatprep.mubr.bf16.mxu1 %v3656_v33  ;;  %1864 = vmatprep.mubr.bf16.mxu0 %v3568_v11 }
  0xea   :  { %1494 = vmatmul.mubr.bf16.gmra.mrb[100].mxu1 %v3679_v38  ;;  %1865 = vmatmul.mubr.bf16.vlgmr.msra.gmra.mrb[100].mxu0 %v3598_v19 }
  0xeb   :  { %1501 = vmatprep.mubr.bf16.mxu1 %v3695_v42  ;;  %1872 = vmatprep.mubr.bf16.mxu0 %v3614_v23 }
  0xf2   :  { %1502 = vmatmul.mubr.bf16.gmra.mrb[104].mxu1 %v3715_v46  ;;  %1873 = vmatmul.mubr.bf16.gmra.mrb[104].mxu0 %v3640_v29 }
  0xf3   :  { %1509 = vmatprep.mubr.bf16.mxu1 %v3731_v50  ;;  %1880 = vmatprep.mubr.bf16.mxu0 %v3656_v33 }
  0xf5   :  { %v2762_v20 = vpop.f32.mrb[0].mxu0  ;;  %v2816_v24 = vpop.f32.mrb[0].mxu1 }
  0xf6   :  { %v2763_v11 = vpop.f32.mrb[1].mxu0  ;;  %v2817_v30 = vpop.f32.mrb[1].mxu1 }
  0xf7   :  { %v4044_v19 = vadd.f32 %v2763_v11, %v2762_v20  ;;  %v2765_v39 = vpop.f32.mrb[2].mxu0  ;;  %v4046_v43 = vadd.f32 %v2817_v30, %v2816_v24  ;;  %v2819_v23 = vpop.f32.mrb[2].mxu1 }
  0xf8   :  { %v2766_v47 = vpop.f32.mrb[3].mxu0  ;;  %v2820_v51 = vpop.f32.mrb[3].mxu1 }
  0xf9   :  { %v2767_v29 = vadd.f32 %v2766_v47, %v2765_v39  ;;  %v623_v55 = vrot.slane %v4046_v43, 1  ;;  %v2821_v58 = vadd.f32 %v2820_v51, %v2819_v23  ;;  %v605_v33 = vrot.slane %v4044_v19, 1  ;;  %v3478_v19 = vld [vmem:[%s4883_s0 + $0x58] sm:$0xff]   ;;  %v3482_v43 = vld [vmem:[%s4883_s0 + $0x68] sm:$0xff]  }
  0xfa   :  { %1510 = vmatmul.mubr.bf16.gmra.mrb[108].mxu1 %v3751_v54  ;;  %1881 = vmatmul.mubr.bf16.gmra.mrb[108].mxu0 %v3679_v38 }
  0xfb   :  { %v606_v63 = vrot.slane %v2767_v29, 1  ;;  %1517 = vmatprep.mubr.bf16.mxu1 %v3764_v57  ;;  %1888 = vmatprep.mubr.bf16.mxu0 %v3695_v42  ;;  %v624_v2 = vrot.slane %v2821_v58, 1 }
  0xfd   :  { %v2768_v15 = vpop.f32.mrb[4].mxu0  ;;  %v2822_v16 = vpop.f32.mrb[4].mxu1  ;;  %v4059_v21 = vsel %vm639_vm0, %v605_v33, %v606_v63  ;;  %v4065_v38 = vsel %vm639_vm0, %v623_v55, %v624_v2 }
  0xfe   :  { %v2769_v22 = vpop.f32.mrb[5].mxu0  ;;  %v2823_v25 = vpop.f32.mrb[5].mxu1 }
  0xff   :  { %v2770_v26 = vadd.f32 %v2769_v22, %v2768_v15  ;;  %v2771_v28 = vpop.f32.mrb[6].mxu0  ;;  %v2824_v42 = vadd.f32 %v2823_v25, %v2822_v16  ;;  %v2825_v31 = vpop.f32.mrb[6].mxu1 }
 0x100   :  { %v2772_v32 = vpop.f32.mrb[7].mxu0  ;;  %v2826_v35 = vpop.f32.mrb[7].mxu1 }
 0x101   :  { %v607_v36 = vrot.slane %v2770_v26, 1  ;;  %v2773_v37 = vadd.f32 %v2772_v32, %v2771_v28  ;;  %v625_v40 = vrot.slane %v2824_v42, 1  ;;  %v2827_v41 = vadd.f32 %v2826_v35, %v2825_v31 }
 0x102   :  { %1518 = vmatmul.mubr.bf16.gmra.mrb[112].mxu1 %v3787_v62  ;;  %1889 = vmatmul.mubr.bf16.gmra.mrb[112].mxu0 %v3715_v46 }
 0x103   :  { %v608_v44 = vrot.slane %v2773_v37, 1  ;;  %1525 = vmatprep.mubr.bf16.mxu1 %v3800_v1  ;;  %1896 = vmatprep.mubr.bf16.mxu0 %v3731_v50  ;;  %v626_v45 = vrot.slane %v2827_v41, 1  ;;  %v4073_v48 = vsel %vm639_vm0, %v606_v63, %v607_v36  ;;  %v4077_v49 = vsel %vm639_vm0, %v624_v2, %v625_v40 }
 0x105   :  { %v2774_v52 = vpop.f32.mrb[8].mxu0  ;;  %v2828_v53 = vpop.f32.mrb[8].mxu1  ;;  %v4081_v56 = vsel %vm639_vm0, %v607_v36, %v608_v44  ;;  %v4085_v46 = vsel %vm639_vm0, %v625_v40, %v626_v45 }
 0x106   :  { %v2775_v50 = vpop.f32.mrb[9].mxu0  ;;  %v2829_v59 = vpop.f32.mrb[9].mxu1 }
 0x107   :  { %v2776_v60 = vadd.f32 %v2775_v50, %v2774_v52  ;;  %v2777_v61 = vpop.f32.mrb[10].mxu0  ;;  %v2830_v0 = vadd.f32 %v2829_v59, %v2828_v53  ;;  %v2831_v3 = vpop.f32.mrb[10].mxu1 }
 0x108   :  { %v2778_v4 = vpop.f32.mrb[11].mxu0  ;;  %v2832_v5 = vpop.f32.mrb[11].mxu1 }
 0x109   :  { %v609_v6 = vrot.slane %v2776_v60, 1  ;;  %v2779_v7 = vadd.f32 %v2778_v4, %v2777_v61  ;;  %v627_v10 = vrot.slane %v2830_v0, 1  ;;  %v2833_v14 = vadd.f32 %v2832_v5, %v2831_v3  ;;  %v3473_v5 = vld [vmem:[%s4882_s1 + $0x48] sm:$0xff]  }
 0x10a   :  { %1526 = vmatmul.mubr.bf16.gmra.mrb[116].mxu1 %v3829_v8  ;;  %1897 = vmatmul.mubr.bf16.gmra.mrb[116].mxu0 %v3751_v54 }
 0x10b   :  { %v610_v12 = vrot.slane %v2779_v7, 1  ;;  %1533 = vmatprep.mubr.bf16.mxu1 %v3842_v13  ;;  %1904 = vmatprep.mubr.bf16.mxu0 %v3764_v57  ;;  %v628_v20 = vrot.slane %v2833_v14, 1  ;;  %v4093_v24 = vsel %vm639_vm0, %v608_v44, %v609_v6  ;;  %v4097_v11 = vsel %vm639_vm0, %v626_v45, %v627_v10 }
 0x10d   :  { %v2780_v30 = vpop.f32.mrb[12].mxu0  ;;  %v2834_v39 = vpop.f32.mrb[12].mxu1  ;;  %v4101_v23 = vsel %vm639_vm0, %v609_v6, %v610_v12  ;;  %v4105_v54 = vsel %vm639_vm0, %v627_v10, %v628_v20 }
 0x10e   :  { %v2781_v57 = vpop.f32.mrb[13].mxu0  ;;  %v2835_v47 = vpop.f32.mrb[13].mxu1 }
 0x10f   :  { %v2782_v51 = vadd.f32 %v2781_v57, %v2780_v30  ;;  %v2783_v29 = vpop.f32.mrb[14].mxu0  ;;  %v2836_v58 = vadd.f32 %v2835_v47, %v2834_v39  ;;  %v2837_v63 = vpop.f32.mrb[14].mxu1 }
 0x110   :  { %v2784_v2 = vpop.f32.mrb[15].mxu0  ;;  %v2838_v15 = vpop.f32.mrb[15].mxu1 }
 0x111   :  { %v611_v16 = vrot.slane %v2782_v51, 1  ;;  %v2785_v22 = vadd.f32 %v2784_v2, %v2783_v29  ;;  %v629_v25 = vrot.slane %v2836_v58, 1  ;;  %v2839_v26 = vadd.f32 %v2838_v15, %v2837_v63 }
 0x112   :  { %1534 = vmatmul.mubr.bf16.gmra.mrb[120].mxu1 %v3860_v17  ;;  %1905 = vmatmul.mubr.bf16.gmra.mrb[120].mxu0 %v3787_v62 }
 0x113   :  { %v612_v28 = vrot.slane %v2785_v22, 1  ;;  %1541 = vmatprep.mubr.bf16.mxu1 %v3865_v18  ;;  %1912 = vmatprep.mubr.bf16.mxu0 %v3800_v1  ;;  %v630_v42 = vrot.slane %v2839_v26, 1  ;;  %v4113_v31 = vsel %vm639_vm0, %v610_v12, %v611_v16  ;;  %v4117_v32 = vsel %vm639_vm0, %v628_v20, %v629_v25  ;;  %v3475_v26 = vld [vmem:[%s4882_s1 + $0x50] sm:$0xff]  }
 0x115   :  { %v2786_v35 = vpop.f32.mrb[16].mxu0  ;;  %v2840_v36 = vpop.f32.mrb[16].mxu1  ;;  %v4121_v37 = vsel %vm639_vm0, %v611_v16, %v612_v28  ;;  %v4125_v62 = vsel %vm639_vm0, %v629_v25, %v630_v42  ;;  %v3474_v16 = vld [vmem:[%s4883_s0 + $0x48] sm:$0xff]  }
 0x116   :  { %v2787_v1 = vpop.f32.mrb[17].mxu0  ;;  %v2841_v40 = vpop.f32.mrb[17].mxu1 }
 0x117   :  { %v2788_v41 = vadd.f32 %v2787_v1, %v2786_v35  ;;  %v2789_v44 = vpop.f32.mrb[18].mxu0  ;;  %v2842_v45 = vadd.f32 %v2841_v40, %v2840_v36  ;;  %v2843_v52 = vpop.f32.mrb[18].mxu1 }
 0x118   :  { %v2790_v53 = vpop.f32.mrb[19].mxu0  ;;  %v2844_v50 = vpop.f32.mrb[19].mxu1 }
 0x119   :  { %v613_v59 = vrot.slane %v2788_v41, 1  ;;  %v2791_v60 = vadd.f32 %v2790_v53, %v2789_v44  ;;  %v631_v61 = vrot.slane %v2842_v45, 1  ;;  %v2845_v0 = vadd.f32 %v2844_v50, %v2843_v52 }
 0x11a   :  { %1542 = vmatmul.mubr.bf16.gmra.mrb[124].mxu1 %v3886_v27  ;;  %1913 = vmatmul.mubr.bf16.gmra.mrb[124].mxu0 %v3829_v8 }
 0x11b   :  { %v614_v3 = vrot.slane %v2791_v60, 1  ;;  %v632_v4 = vrot.slane %v2845_v0, 1  ;;  %1549 = vmatprep.mubr.bf16.mxu1 %v3473_v5  ;;  %1920 = vmatprep.mubr.bf16.mxu0 %v3842_v13  ;;  %v4135_v6 = vsel %vm639_vm0, %v612_v28, %v613_v59  ;;  %v4139_v7 = vsel %vm639_vm0, %v630_v42, %v631_v61 }
 0x11d   :  { %v2792_v10 = vpop.f32.mrb[20].mxu0  ;;  %v2846_v14 = vpop.f32.mrb[20].mxu1  ;;  %v4143_v8 = vsel %vm639_vm0, %v613_v59, %v614_v3  ;;  %v4147_v12 = vsel %vm639_vm0, %v631_v61, %v632_v4 }
 0x11e   :  { %v2793_v20 = vpop.f32.mrb[21].mxu0  ;;  %v2847_v13 = vpop.f32.mrb[21].mxu1 }
 0x11f   :  { %v2794_v30 = vadd.f32 %v2793_v20, %v2792_v10  ;;  %v2795_v39 = vpop.f32.mrb[22].mxu0  ;;  %v2848_v57 = vadd.f32 %v2847_v13, %v2846_v14  ;;  %v2849_v47 = vpop.f32.mrb[22].mxu1  ;;  %v3477_v14 = vld [vmem:[%s4882_s1 + $0x58] sm:$0xff]  }
 0x120   :  { %v2796_v51 = vpop.f32.mrb[23].mxu0  ;;  %v2850_v29 = vpop.f32.mrb[23].mxu1 }
 0x121   :  { %v615_v58 = vrot.slane %v2794_v30, 1  ;;  %v2797_v63 = vadd.f32 %v2796_v51, %v2795_v39  ;;  %v633_v2 = vrot.slane %v2848_v57, 1  ;;  %v2851_v15 = vadd.f32 %v2850_v29, %v2849_v47 }
 0x122   :  { %1550 = vmatmul.mubr.bf16.gmra.mrb[128].mxu1 %v3474_v16  ;;  %1921 = vmatmul.mubr.bf16.gmra.mrb[128].mxu0 %v3860_v17 }
 0x123   :  { %v616_v22 = vrot.slane %v2797_v63, 1  ;;  %v634_v25 = vrot.slane %v2851_v15, 1  ;;  %1557 = vmatprep.mubr.bf16.mxu1 %v3475_v26  ;;  %1928 = vmatprep.mubr.bf16.mxu0 %v3865_v18  ;;  %v4159_v28 = vsel %vm639_vm0, %v614_v3, %v615_v58  ;;  %v4163_v42 = vsel %vm639_vm0, %v632_v4, %v633_v2  ;;  %v3476_v3 = vld [vmem:[%s4883_s0 + $0x50] sm:$0xff]  }
 0x125   :  { %v2798_v35 = vpop.f32.mrb[24].mxu0  ;;  %v2852_v36 = vpop.f32.mrb[24].mxu1  ;;  %v4167_v17 = vsel %vm639_vm0, %v615_v58, %v616_v22  ;;  %v4171_v1 = vsel %vm639_vm0, %v633_v2, %v634_v25 }
 0x126   :  { %v2799_v40 = vpop.f32.mrb[25].mxu0  ;;  %v2853_v18 = vpop.f32.mrb[25].mxu1 }
 0x127   :  { %v2800_v41 = vadd.f32 %v2799_v40, %v2798_v35  ;;  %v2854_v44 = vadd.f32 %v2853_v18, %v2852_v36  ;;  %v2801_v45 = vpop.f32.mrb[26].mxu0  ;;  %v2855_v52 = vpop.f32.mrb[26].mxu1 }
 0x128   :  { %v2802_v53 = vpop.f32.mrb[27].mxu0  ;;  %v2856_v50 = vpop.f32.mrb[27].mxu1 }
 0x129   :  { %v617_v59 = vrot.slane %v2800_v41, 1  ;;  %v635_v60 = vrot.slane %v2854_v44, 1  ;;  %v2803_v61 = vadd.f32 %v2802_v53, %v2801_v45  ;;  %v2857_v0 = vadd.f32 %v2856_v50, %v2855_v52  ;;  %v3479_v41 = vld [vmem:[%s4882_s1 + $0x60] sm:$0xff]  }
 0x12a   :  { %1558 = vmatmul.mubr.bf16.gmra.mrb[132].mxu1 %v3476_v3  ;;  %1929 = vmatmul.mubr.bf16.gmra.mrb[132].mxu0 %v3886_v27 }
 0x12b   :  { %v618_v4 = vrot.slane %v2803_v61, 1  ;;  %v636_v10 = vrot.slane %v2857_v0, 1  ;;  %1565 = vmatprep.mubr.bf16.mxu1 %v3477_v14  ;;  %1936 = vmatprep.mubr.bf16.mxu0 %v3473_v5  ;;  %v4182_v20 = vsel %vm639_vm0, %v616_v22, %v617_v59  ;;  %v4186_v13 = vsel %vm639_vm0, %v634_v25, %v635_v60 }
 0x12d   :  { %v2804_v30 = vpop.f32.mrb[28].mxu0  ;;  %v2874_v39 = vpop.f32.mrb[28].mxu1  ;;  %v4190_v27 = vsel %vm639_vm0, %v617_v59, %v618_v4  ;;  %v4194_v57 = vsel %vm639_vm0, %v635_v60, %v636_v10  ;;  %v4200_v5 = vsel %vm639_vm0, %v636_v10, %v605_v33 }
 0x12e   :  { %v2805_v47 = vpop.f32.mrb[29].mxu0  ;;  %v2875_v51 = vpop.f32.mrb[29].mxu1 }
 0x12f   :  { %v2806_v29 = vadd.f32 %v2805_v47, %v2804_v30  ;;  %v2876_v58 = vadd.f32 %v2875_v51, %v2874_v39  ;;  %v2807_v63 = vpop.f32.mrb[30].mxu0  ;;  %v2877_v2 = vpop.f32.mrb[30].mxu1  ;;  %v3480_v39 = vld [vmem:[%s4883_s0 + $0x60] sm:$0xff]  }
 0x130   :  { %v2808_v15 = vpop.f32.mrb[31].mxu0  ;;  %v2878_v22 = vpop.f32.mrb[31].mxu1 }
 0x131   :  { %v619_v25 = vrot.slane %v2806_v29, 1  ;;  %v4203_v35 = vadd.f32 %v2876_v58, %v4059_v21  ;;  %v2809_v36 = vadd.f32 %v2808_v15, %v2807_v63  ;;  %v2879_v40 = vadd.f32 %v2878_v22, %v2877_v2  ;;  %v3481_v29 = vld [vmem:[%s4882_s1 + $0x68] sm:$0xff]  }
 0x132   :  { %1566 = vmatmul.mubr.bf16.gmra.mrb[136].mxu1 %v3478_v19  ;;  %1937 = vmatmul.mubr.bf16.gmra.mrb[136].mxu0 %v3474_v16 }
 0x133   :  { %v620_v33 = vrot.slane %v2809_v36, 1  ;;  %v4209_v18 = vadd.f32 %v2879_v40, %v4073_v48  ;;  %1573 = vmatprep.mubr.bf16.mxu1 %v3479_v41  ;;  %1944 = vmatprep.mubr.bf16.mxu0 %v3475_v26  ;;  %v4216_v21 = vsel %vm639_vm0, %v618_v4, %v619_v25 }
 0x135   :  { %v2810_v44 = vpop.f32.mrb[32].mxu0  ;;  %v2880_v45 = vpop.f32.mrb[32].mxu1  ;;  %v4220_v52 = vsel %vm639_vm0, %v619_v25, %v620_v33 }
 0x136   :  { %v2811_v16 = vpop.f32.mrb[33].mxu0  ;;  %v2881_v53 = vpop.f32.mrb[33].mxu1 }
 0x137   :  { %v2812_v48 = vadd.f32 %v2811_v16, %v2810_v44  ;;  %v2882_v50 = vadd.f32 %v2881_v53, %v2880_v45  ;;  %v2813_v59 = vpop.f32.mrb[34].mxu0  ;;  %v2883_v60 = vpop.f32.mrb[34].mxu1 }
 0x138   :  { %v2814_v61 = vpop.f32.mrb[35].mxu0  ;;  %v2884_v0 = vpop.f32.mrb[35].mxu1 }
 0x139   :  { %v621_v10 = vrot.slane %v2812_v48, 1  ;;  %v4223_v26 = vadd.f32 %v2882_v50, %v4081_v56  ;;  %v2815_v4 = vadd.f32 %v2814_v61, %v2813_v59  ;;  %v2885_v30 = vadd.f32 %v2884_v0, %v2883_v60 }
 0x13a   :  { %1574 = vmatmul.mubr.bf16.gmra.mrb[140].mxu1 %v3480_v39  ;;  %1945 = vmatmul.mubr.bf16.gmra.mrb[140].mxu0 %v3476_v3 }
 0x13b   :  { %v622_v47 = vrot.slane %v2815_v4, 1  ;;  %v4229_v51 = vadd.f32 %v2885_v30, %v4093_v24  ;;  %1581 = vmatprep.mubr.bf16.mxu1 %v3481_v29  ;;  %1952 = vmatprep.mubr.bf16.mxu0 %v3477_v14  ;;  %v4236_v56 = vsel %vm639_vm0, %v620_v33, %v621_v10 }
 0x13d   :  { %v2886_v58 = vpop.f32.mrb[36].mxu1  ;;  %v2986_v63 = vpop.f32.mrb[36].mxu0  ;;  %v4240_v2 = vsel %vm639_vm0, %v621_v10, %v622_v47  ;;  %v4246_v24 = vsel %vm639_vm0, %v622_v47, %v623_v55 }
 0x13e   :  { %v2887_v3 = vpop.f32.mrb[37].mxu1  ;;  %v2987_v15 = vpop.f32.mrb[37].mxu0 }
 0x13f   :  { %v2888_v22 = vadd.f32 %v2887_v3, %v2886_v58  ;;  %v4248_v14 = vadd.f32 %v2987_v15, %v2986_v63  ;;  %v2889_v25 = vpop.f32.mrb[38].mxu1  ;;  %v2989_v36 = vpop.f32.mrb[38].mxu0 }
 0x140   :  { %v2890_v40 = vpop.f32.mrb[39].mxu1  ;;  %v2990_v33 = vpop.f32.mrb[39].mxu0 }
 0x141   :  { %v4251_v44 = vadd.f32 %v2888_v22, %v4101_v23  ;;  %v2891_v45 = vadd.f32 %v2890_v40, %v2889_v25  ;;  %v2991_v16 = vadd.f32 %v2990_v33, %v2989_v36  ;;  %v1219_v55 = vrot.slane %v4248_v14, 2  ;;  %v3483_v23 = vld [vmem:[%s4882_s1 + $0x70] sm:$0xff]  }
 0x142   :  { %1582 = vmatmul.mubr.bf16.gmra.mrb[144].mxu1 %v3482_v43  ;;  %1953 = vmatmul.mubr.bf16.gmra.mrb[144].mxu0 %v3478_v19  ;;  %v3484_v22 = vld [vmem:[%s4883_s0 + $0x70] sm:$0xff]  }
 0x143   :  { %v4259_v53 = vadd.f32 %v2891_v45, %v4113_v31  ;;  %v1220_v48 = vrot.slane %v2991_v16, 2  ;;  %1589 = vmatprep.mubr.bf16.mxu1 %v3483_v23  ;;  %1960 = vmatprep.mubr.bf16.mxu0 %v3479_v41 }
 0x145   :  { %v1282_v50 = vsel %vm1251_vm1, %v1219_v55, %v1220_v48  ;;  %v2892_v59 = vpop.f32.mrb[40].mxu1  ;;  %v2992_v60 = vpop.f32.mrb[40].mxu0 }
 0x146   :  { %v4269_v19 = vadd.f32 %v1282_v50, %v4203_v35  ;;  %v2893_v61 = vpop.f32.mrb[41].mxu1  ;;  %v2993_v31 = vpop.f32.mrb[41].mxu0 }
 0x147   :  { %v2894_v0 = vadd.f32 %v2893_v61, %v2892_v59  ;;  %v2994_v10 = vadd.f32 %v2993_v31, %v2992_v60  ;;  %v2895_v4 = vpop.f32.mrb[42].mxu1  ;;  %v2995_v30 = vpop.f32.mrb[42].mxu0 }
 0x148   :  { %v2896_v47 = vpop.f32.mrb[43].mxu1  ;;  %v2996_v58 = vpop.f32.mrb[43].mxu0 }
 0x149   :  { %v827_v41 = vadd.f32 %v2894_v0, %v4121_v37  ;;  %v1221_v63 = vrot.slane %v2994_v10, 2  ;;  %v2897_v3 = vadd.f32 %v2896_v47, %v2895_v4  ;;  %v2997_v15 = vadd.f32 %v2996_v58, %v2995_v30  ;;  %v3485_v37 = vld [vmem:[%s4882_s1 + $0x78] sm:$0xff]  }
 0x14a   :  { %1590 = vmatmul.mubr.bf16.gmra.mrb[148].mxu1 %v3484_v22  ;;  %1961 = vmatmul.mubr.bf16.gmra.mrb[148].mxu0 %v3480_v39 }
 0x14b   :  { %v1281_v35 = vsel %vm1251_vm1, %v1220_v48, %v1221_v63  ;;  %v4278_v25 = vadd.f32 %v2897_v3, %v4135_v6  ;;  %v1222_v36 = vrot.slane %v2997_v15, 2  ;;  %1597 = vmatprep.mubr.bf16.mxu1 %v3485_v37  ;;  %1968 = vmatprep.mubr.bf16.mxu0 %v3481_v29 }
 0x14c   :  { %v4284_v40 = vadd.f32 %v1281_v35, %v4209_v18 }
 0x14d   :  { %v1280_v33 = vsel %vm1251_vm1, %v1221_v63, %v1222_v36  ;;  %v2898_v39 = vpop.f32.mrb[44].mxu1  ;;  %v2998_v45 = vpop.f32.mrb[44].mxu0 }
 0x14e   :  { %v4289_v16 = vadd.f32 %v1280_v33, %v4223_v26  ;;  %v2899_v6 = vpop.f32.mrb[45].mxu1  ;;  %v2999_v48 = vpop.f32.mrb[45].mxu0 }
 0x14f   :  { %v2900_v50 = vadd.f32 %v2899_v6, %v2898_v39  ;;  %v3000_v59 = vadd.f32 %v2999_v48, %v2998_v45  ;;  %v2901_v60 = vpop.f32.mrb[46].mxu1  ;;  %v3001_v61 = vpop.f32.mrb[46].mxu0 }
 0x150   :  { %v2902_v31 = vpop.f32.mrb[47].mxu1  ;;  %v3002_v0 = vpop.f32.mrb[47].mxu0 }
 0x151   :  { %v835_v29 = vadd.f32 %v2900_v50, %v4143_v8  ;;  %v1223_v18 = vrot.slane %v3000_v59, 2  ;;  %v2903_v10 = vadd.f32 %v2902_v31, %v2901_v60  ;;  %v3003_v4 = vadd.f32 %v3002_v0, %v3001_v61 }
 0x152   :  { %1598 = vmatmul.mubr.bf16.gmra.mrb[152].mxu1 %v3834_v9  ;;  %1969 = vmatmul.mubr.bf16.gmra.mrb[152].mxu0 %v3482_v43 }
 0x153   :  { %v1279_v26 = vsel %vm1251_vm1, %v1222_v36, %v1223_v18  ;;  %v4296_v30 = vadd.f32 %v2903_v10, %v4159_v28  ;;  %v1224_v47 = vrot.slane %v3003_v4, 2  ;;  %1976 = vmatprep.mubr.bf16.mxu0 %v3483_v23 }
 0x154   :  { %v4299_v58 = vadd.f32 %v1279_v26, %v4229_v51 }
 0x155   :  { %v1278_v8 = vsel %vm1251_vm1, %v1223_v18, %v1224_v47  ;;  %v2904_v63 = vpop.f32.mrb[48].mxu1  ;;  %v3004_v3 = vpop.f32.mrb[48].mxu0 }
 0x156   :  { %v4304_v15 = vadd.f32 %v1278_v8, %v4251_v44  ;;  %v2905_v9 = vpop.f32.mrb[49].mxu1  ;;  %v3005_v43 = vpop.f32.mrb[49].mxu0 }
 0x157   :  { %v2906_v35 = vadd.f32 %v2905_v9, %v2904_v63  ;;  %v3006_v36 = vadd.f32 %v3005_v43, %v3004_v3  ;;  %v2907_v33 = vpop.f32.mrb[50].mxu1  ;;  %v3007_v28 = vpop.f32.mrb[50].mxu0  ;;  %v3486_v9 = vld [vmem:[%s4883_s0 + $0x78] sm:$0xff]  }
 0x158   :  { %v2908_v39 = vpop.f32.mrb[51].mxu1  ;;  %v3008_v45 = vpop.f32.mrb[51].mxu0 }
 0x159   :  { %v843_v23 = vadd.f32 %v2906_v35, %v4167_v17  ;;  %v1225_v51 = vrot.slane %v3006_v36, 2  ;;  %v2909_v6 = vadd.f32 %v2908_v39, %v2907_v33  ;;  %v3009_v48 = vadd.f32 %v3008_v45, %v3007_v28 }
 0x15a   :  { %1977 = vmatmul.mubr.bf16.gmra.mrb[156].mxu0 %v3484_v22 }
 0x15b   :  { %v1277_v50 = vsel %vm1251_vm1, %v1224_v47, %v1225_v51  ;;  %v4310_v44 = vadd.f32 %v2909_v6, %v4182_v20  ;;  %v1226_v59 = vrot.slane %v3009_v48, 2  ;;  %1984 = vmatprep.mubr.bf16.mxu0 %v3485_v37 }
 0x15c   :  { %v4313_v60 = vadd.f32 %v1277_v50, %v4259_v53 }
 0x15d   :  { %v1276_v61 = vsel %vm1251_vm1, %v1225_v51, %v1226_v59  ;;  %v2910_v31 = vpop.f32.mrb[52].mxu1  ;;  %v3010_v17 = vpop.f32.mrb[52].mxu0 }
 0x15e   :  { %v4317_v0 = vadd.f32 %v1276_v61, %v827_v41  ;;  %v2911_v18 = vpop.f32.mrb[53].mxu1  ;;  %v3011_v22 = vpop.f32.mrb[53].mxu0 }
 0x15f   :  { %v2912_v10 = vadd.f32 %v2911_v18, %v2910_v31  ;;  %v3012_v4 = vadd.f32 %v3011_v22, %v3010_v17  ;;  %v2913_v26 = vpop.f32.mrb[54].mxu1  ;;  %v3013_v47 = vpop.f32.mrb[54].mxu0 }
 0x160   :  { %v2914_v20 = vpop.f32.mrb[55].mxu1  ;;  %v3014_v8 = vpop.f32.mrb[55].mxu0 }
 0x161   :  { %v851_v37 = vadd.f32 %v2912_v10, %v4190_v27  ;;  %v1227_v63 = vrot.slane %v3012_v4, 2  ;;  %v2915_v53 = vadd.f32 %v2914_v20, %v2913_v26  ;;  %v3015_v3 = vadd.f32 %v3014_v8, %v3013_v47 }
 0x162   :  { %1985 = vmatmul.mubr.bf16.gmra.mrb[160].mxu0 %v3486_v9 }
 0x163   :  { %v1275_v41 = vsel %vm1251_vm1, %v1226_v59, %v1227_v63  ;;  %v4326_v43 = vadd.f32 %v2915_v53, %v4216_v21  ;;  %v1228_v35 = vrot.slane %v3015_v3, 2 }
 0x164   :  { %v4329_v36 = vadd.f32 %v1275_v41, %v4278_v25 }
 0x165   :  { %v1274_v27 = vsel %vm1251_vm1, %v1227_v63, %v1228_v35  ;;  %v2916_v33 = vpop.f32.mrb[56].mxu1  ;;  %v3016_v28 = vpop.f32.mrb[56].mxu0 }
 0x166   :  { %v4333_v39 = vadd.f32 %v1274_v27, %v835_v29  ;;  %v2917_v45 = vpop.f32.mrb[57].mxu1  ;;  %v3017_v51 = vpop.f32.mrb[57].mxu0 }
 0x167   :  { %v2918_v6 = vadd.f32 %v2917_v45, %v2916_v33  ;;  %v3018_v48 = vadd.f32 %v3017_v51, %v3016_v28  ;;  %v2919_v50 = vpop.f32.mrb[58].mxu1  ;;  %v3019_v59 = vpop.f32.mrb[58].mxu0 }
 0x168   :  { %v2920_v61 = vpop.f32.mrb[59].mxu1  ;;  %v3020_v21 = vpop.f32.mrb[59].mxu0 }
 0x169   :  { %v859_v31 = vadd.f32 %v2918_v6, %v4220_v52  ;;  %v1229_v17 = vrot.slane %v3018_v48, 2  ;;  %v2921_v25 = vadd.f32 %v2920_v61, %v2919_v50  ;;  %v3021_v18 = vadd.f32 %v3020_v21, %v3019_v59 }
 0x16b   :  { %v1273_v22 = vsel %vm1251_vm1, %v1228_v35, %v1229_v17  ;;  %v4339_v10 = vadd.f32 %v2921_v25, %v4236_v56  ;;  %v1230_v29 = vrot.slane %v3021_v18, 2 }
 0x16c   :  { %v4342_v4 = vadd.f32 %v1273_v22, %v4296_v30 }
 0x16d   :  { %v1272_v26 = vsel %vm1251_vm1, %v1229_v17, %v1230_v29  ;;  %v2922_v47 = vpop.f32.mrb[60].mxu1  ;;  %v3022_v20 = vpop.f32.mrb[60].mxu0  ;;  %v3490_v17 = vmov 0.0  }
 0x16e   :  { %v4346_v8 = vadd.f32 %v1272_v26, %v843_v23  ;;  %v2923_v52 = vpop.f32.mrb[61].mxu1  ;;  %v3023_v63 = vpop.f32.mrb[61].mxu0  ;;  %3315 = vmatprep.subr.bf16.mxu1 %v3490_v17  ;;  %3331 = vmatprep.mubr.msk.bf16.mxu1 %vm3491_vm4, %v3490_v17 }
 0x16f   :  { %v2924_v53 = vadd.f32 %v2923_v52, %v2922_v47  ;;  %v3024_v3 = vadd.f32 %v3023_v63, %v3022_v20  ;;  %v2925_v9 = vpop.f32.mrb[62].mxu1  ;;  %v3025_v41 = vpop.f32.mrb[62].mxu0 }
 0x170   :  { %v2926_v35 = vpop.f32.mrb[63].mxu1  ;;  %v3026_v56 = vpop.f32.mrb[63].mxu0 }
 0x171   :  { %v867_v27 = vadd.f32 %v2924_v53, %v4240_v2  ;;  %v1231_v33 = vrot.slane %v3024_v3, 2  ;;  %v2927_v30 = vadd.f32 %v2926_v35, %v2925_v9  ;;  %v3027_v28 = vadd.f32 %v3026_v56, %v3025_v41 }
 0x173   :  { %v1271_v45 = vsel %vm1251_vm1, %v1230_v29, %v1231_v33  ;;  %v4352_v51 = vadd.f32 %v2927_v30, %v4246_v24  ;;  %v1232_v23 = vrot.slane %v3027_v28, 2 }
 0x174   :  { %v4355_v6 = vadd.f32 %v1271_v45, %v4310_v44  ;;  %v3465_v44 = vld [vmem:[%s4884_s5] sm:$0xff]  }
 0x175   :  { %v1270_v48 = vsel %vm1251_vm1, %v1231_v33, %v1232_v23  ;;  %v2928_v50 = vpop.f32.mrb[64].mxu1  ;;  %v3028_v59 = vpop.f32.mrb[64].mxu0  ;;  %3316 = vmatpush3.bf16.msra.mxu1 %v3465_v44 }
 0x176   :  { %v4359_v61 = vadd.f32 %v1270_v48, %v851_v37  ;;  %v2929_v2 = vpop.f32.mrb[65].mxu1  ;;  %v3029_v21 = vpop.f32.mrb[65].mxu0  ;;  %3317 = vmatprep.subr.bf16.mxu1 %v3490_v17 }
 0x177   :  { %v2930_v25 = vadd.f32 %v2929_v2, %v2928_v50  ;;  %v3030_v18 = vadd.f32 %v3029_v21, %v3028_v59  ;;  %v2931_v24 = vpop.f32.mrb[66].mxu1  ;;  %v3031_v22 = vpop.f32.mrb[66].mxu0 }
 0x178   :  { %v2932_v29 = vpop.f32.mrb[67].mxu1  ;;  %v3032_v26 = vpop.f32.mrb[67].mxu0 }
 0x179   :  { %v875_v47 = vadd.f32 %v2930_v25, %v4065_v38  ;;  %v1233_v20 = vrot.slane %v3030_v18, 2  ;;  %v2933_v37 = vadd.f32 %v2932_v29, %v2931_v24  ;;  %v3033_v52 = vadd.f32 %v3032_v26, %v3031_v22 }
 0x17b   :  { %v1269_v63 = vsel %vm1251_vm1, %v1232_v23, %v1233_v20  ;;  %v4370_v53 = vadd.f32 %v2933_v37, %v4077_v49  ;;  %v1234_v3 = vrot.slane %v3033_v52, 2 }
 0x17c   :  { %v4373_v9 = vadd.f32 %v1269_v63, %v4326_v43 }
 0x17d   :  { %v1268_v41 = vsel %vm1251_vm1, %v1233_v20, %v1234_v3  ;;  %v2934_v38 = vpop.f32.mrb[68].mxu1  ;;  %v3034_v35 = vpop.f32.mrb[68].mxu0 }
 0x17e   :  { %v4377_v56 = vadd.f32 %v1268_v41, %v859_v31  ;;  %v2935_v33 = vpop.f32.mrb[69].mxu1  ;;  %v3035_v30 = vpop.f32.mrb[69].mxu0 }
 0x17f   :  { %v2936_v28 = vadd.f32 %v2935_v33, %v2934_v38  ;;  %v3036_v45 = vadd.f32 %v3035_v30, %v3034_v35  ;;  %v2937_v48 = vpop.f32.mrb[70].mxu1  ;;  %v3037_v23 = vpop.f32.mrb[70].mxu0 }
 0x180   :  { %v2938_v50 = vpop.f32.mrb[71].mxu1  ;;  %v3038_v49 = vpop.f32.mrb[71].mxu0 }
 0x181   :  { %v883_v59 = vadd.f32 %v2936_v28, %v4085_v46  ;;  %v1235_v2 = vrot.slane %v3036_v45, 2  ;;  %v2939_v43 = vadd.f32 %v2938_v50, %v2937_v48  ;;  %v3039_v21 = vadd.f32 %v3038_v49, %v3037_v23  ;;  %v3466_v46 = vld [vmem:[%s4884_s5 + $0x8] sm:$0xff]  }
 0x182   :  { %3318 = vmatpush3.bf16.msra.mxu1 %v3466_v46 }
 0x183   :  { %v1267_v25 = vsel %vm1251_vm1, %v1234_v3, %v1235_v2  ;;  %v4383_v18 = vadd.f32 %v2939_v43, %v4097_v11  ;;  %v1236_v31 = vrot.slane %v3039_v21, 2  ;;  %3319 = vmatprep.subr.bf16.mxu1 %v3490_v17 }
 0x184   :  { %v4386_v24 = vadd.f32 %v1267_v25, %v4339_v10 }
 0x185   :  { %v1266_v22 = vsel %vm1251_vm1, %v1235_v2, %v1236_v31  ;;  %v2940_v44 = vpop.f32.mrb[72].mxu1  ;;  %v3040_v29 = vpop.f32.mrb[72].mxu0 }
 0x186   :  { %v4393_v26 = vadd.f32 %v1266_v22, %v867_v27  ;;  %v2941_v20 = vpop.f32.mrb[73].mxu1  ;;  %v3041_v37 = vpop.f32.mrb[73].mxu0 }
 0x187   :  { %v2942_v52 = vadd.f32 %v2941_v20, %v2940_v44  ;;  %v3042_v11 = vadd.f32 %v3041_v37, %v3040_v29  ;;  %v2943_v63 = vpop.f32.mrb[74].mxu1  ;;  %v3043_v3 = vpop.f32.mrb[74].mxu0 }
 0x188   :  { %v2944_v10 = vpop.f32.mrb[75].mxu1  ;;  %v3044_v41 = vpop.f32.mrb[75].mxu0 }
 0x189   :  { %v891_v38 = vadd.f32 %v2942_v52, %v4105_v54  ;;  %v1237_v35 = vrot.slane %v3042_v11, 2  ;;  %v2945_v33 = vadd.f32 %v2944_v10, %v2943_v63  ;;  %v3045_v30 = vadd.f32 %v3044_v41, %v3043_v3  ;;  %v3467_v11 = vld [vmem:[%s4884_s5 + $0x10] sm:$0xff]  }
 0x18a   :  { %3320 = vmatpush3.bf16.msra.mxu1 %v3467_v11 }
 0x18b   :  { %v1265_v27 = vsel %vm1251_vm1, %v1236_v31, %v1237_v35  ;;  %v4400_v28 = vadd.f32 %v2945_v33, %v4117_v32  ;;  %v1238_v45 = vrot.slane %v3045_v30, 2  ;;  %3321 = vmatprep.subr.bf16.mxu1 %v3490_v17 }
 0x18c   :  { %v4403_v48 = vadd.f32 %v1265_v27, %v4352_v51 }
 0x18d   :  { %v1264_v23 = vsel %vm1251_vm1, %v1237_v35, %v1238_v45  ;;  %v2946_v50 = vpop.f32.mrb[76].mxu1  ;;  %v3046_v49 = vpop.f32.mrb[76].mxu0 }
 0x18e   :  { %v4407_v2 = vadd.f32 %v1264_v23, %v875_v47  ;;  %v2947_v54 = vpop.f32.mrb[77].mxu1  ;;  %v3047_v43 = vpop.f32.mrb[77].mxu0 }
 0x18f   :  { %v2948_v21 = vadd.f32 %v2947_v54, %v2946_v50  ;;  %v3048_v25 = vadd.f32 %v3047_v43, %v3046_v49  ;;  %v2949_v22 = vpop.f32.mrb[78].mxu1  ;;  %v3049_v31 = vpop.f32.mrb[78].mxu0 }
 0x190   :  { %v2950_v44 = vpop.f32.mrb[79].mxu1  ;;  %v3050_v32 = vpop.f32.mrb[79].mxu0 }
 0x191   :  { %v899_v29 = vadd.f32 %v2948_v21, %v4125_v62  ;;  %v1239_v46 = vrot.slane %v3048_v25, 2  ;;  %v2951_v51 = vadd.f32 %v2950_v44, %v2949_v22  ;;  %v3051_v20 = vadd.f32 %v3050_v32, %v3049_v31 }
 0x193   :  { %v1263_v37 = vsel %vm1251_vm1, %v1238_v45, %v1239_v46  ;;  %v4413_v52 = vadd.f32 %v2951_v51, %v4139_v7  ;;  %v1240_v47 = vrot.slane %v3051_v20, 2 }
 0x194   :  { %v4419_v63 = vadd.f32 %v1263_v37, %v4370_v53 }
 0x195   :  { %v1262_v62 = vsel %vm1251_vm1, %v1239_v46, %v1240_v47  ;;  %v2952_v3 = vpop.f32.mrb[80].mxu1  ;;  %v3052_v10 = vpop.f32.mrb[80].mxu0 }
 0x196   :  { %v4423_v41 = vadd.f32 %v1262_v62, %v883_v59  ;;  %v2953_v35 = vpop.f32.mrb[81].mxu1  ;;  %v3053_v33 = vpop.f32.mrb[81].mxu0 }
 0x197   :  { %v2954_v7 = vadd.f32 %v2953_v35, %v2952_v3  ;;  %v3054_v30 = vadd.f32 %v3053_v33, %v3052_v10  ;;  %v2955_v27 = vpop.f32.mrb[82].mxu1  ;;  %v3055_v45 = vpop.f32.mrb[82].mxu0 }
 0x198   :  { %v2956_v23 = vpop.f32.mrb[83].mxu1  ;;  %v3056_v50 = vpop.f32.mrb[83].mxu0 }
 0x199   :  { %v907_v53 = vadd.f32 %v2954_v7, %v4147_v12  ;;  %v1241_v49 = vrot.slane %v3054_v30, 2  ;;  %v2957_v54 = vadd.f32 %v2956_v23, %v2955_v27  ;;  %v3057_v43 = vadd.f32 %v3056_v50, %v3055_v45 }
 0x19b   :  { %v1261_v21 = vsel %vm1251_vm1, %v1240_v47, %v1241_v49  ;;  %v4430_v59 = vadd.f32 %v2957_v54, %v4163_v42  ;;  %v1242_v25 = vrot.slane %v3057_v43, 2 }
 0x19c   :  { %v4433_v22 = vadd.f32 %v1261_v21, %v4383_v18 }
 0x19d   :  { %v1260_v31 = vsel %vm1251_vm1, %v1241_v49, %v1242_v25  ;;  %v2958_v44 = vpop.f32.mrb[84].mxu1  ;;  %v3058_v32 = vpop.f32.mrb[84].mxu0 }
 0x19e   :  { %v4437_v46 = vadd.f32 %v1260_v31, %v891_v38  ;;  %v2959_v12 = vpop.f32.mrb[85].mxu1  ;;  %v3059_v51 = vpop.f32.mrb[85].mxu0 }
 0x19f   :  { %v2960_v20 = vadd.f32 %v2959_v12, %v2958_v44  ;;  %v3060_v37 = vadd.f32 %v3059_v51, %v3058_v32  ;;  %v2961_v11 = vpop.f32.mrb[86].mxu1  ;;  %v3061_v47 = vpop.f32.mrb[86].mxu0 }
 0x1a0   :  { %v2962_v62 = vpop.f32.mrb[87].mxu1  ;;  %v3062_v42 = vpop.f32.mrb[87].mxu0 }
 0x1a1   :  { %v915_v3 = vadd.f32 %v2960_v20, %v4171_v1  ;;  %v1243_v10 = vrot.slane %v3060_v37, 2  ;;  %v2963_v18 = vadd.f32 %v2962_v62, %v2961_v11  ;;  %v3063_v35 = vadd.f32 %v3062_v42, %v3061_v47  ;;  %v3468_v1 = vld [vmem:[%s4884_s5 + $0x18] sm:$0xff]  }
 0x1a2   :  { %3322 = vmatpush3.bf16.msra.mxu1 %v3468_v1 }
 0x1a3   :  { %v1259_v33 = vsel %vm1251_vm1, %v1242_v25, %v1243_v10  ;;  %v4443_v7 = vadd.f32 %v2963_v18, %v4186_v13  ;;  %v1244_v38 = vrot.slane %v3063_v35, 2  ;;  %3323 = vmatprep.subr.bf16.mxu1 %v3490_v17 }
 0x1a4   :  { %v4446_v30 = vadd.f32 %v1259_v33, %v4400_v28 }
 0x1a5   :  { %v1258_v27 = vsel %vm1251_vm1, %v1243_v10, %v1244_v38  ;;  %v2964_v45 = vpop.f32.mrb[88].mxu1  ;;  %v3064_v23 = vpop.f32.mrb[88].mxu0 }
 0x1a6   :  { %v4453_v50 = vadd.f32 %v1258_v27, %v899_v29  ;;  %v2965_v49 = vpop.f32.mrb[89].mxu1  ;;  %v3065_v54 = vpop.f32.mrb[89].mxu0 }
 0x1a7   :  { %v2966_v43 = vadd.f32 %v2965_v49, %v2964_v45  ;;  %v3066_v13 = vadd.f32 %v3065_v54, %v3064_v23  ;;  %v2967_v21 = vpop.f32.mrb[90].mxu1  ;;  %v3067_v25 = vpop.f32.mrb[90].mxu0 }
 0x1a8   :  { %v2968_v28 = vpop.f32.mrb[91].mxu1  ;;  %v3068_v31 = vpop.f32.mrb[91].mxu0 }
 0x1a9   :  { %v923_v44 = vadd.f32 %v2966_v43, %v4194_v57  ;;  %v1245_v32 = vrot.slane %v3066_v13, 2  ;;  %v2969_v12 = vadd.f32 %v2968_v28, %v2967_v21  ;;  %v3069_v51 = vadd.f32 %v3068_v31, %v3067_v25 }
 0x1ab   :  { %v1257_v29 = vsel %vm1251_vm1, %v1244_v38, %v1245_v32  ;;  %v926_v20 = vadd.f32 %v2969_v12, %v4200_v5  ;;  %v1246_v37 = vrot.slane %v3069_v51, 2 }
 0x1ac   :  { %v4461_v11 = vadd.f32 %v1257_v29, %v4413_v52 }
 0x1ad   :  { %v1256_v47 = vsel %vm1251_vm1, %v1245_v32, %v1246_v37  ;;  %v3070_v62 = vpop.f32.mrb[92].mxu0  ;;  %v3098_v42 = vpop.f32.mrb[92].mxu1 }
 0x1ae   :  { %v4465_v10 = vadd.f32 %v1256_v47, %v907_v53  ;;  %v3071_v57 = vpop.f32.mrb[93].mxu0  ;;  %v3099_v18 = vpop.f32.mrb[93].mxu1 }
 0x1af   :  { %v3072_v35 = vadd.f32 %v3071_v57, %v3070_v62  ;;  %v4467_v33 = vadd.f32 %v3099_v18, %v3098_v42  ;;  %v3073_v27 = vpop.f32.mrb[94].mxu0  ;;  %v3101_v38 = vpop.f32.mrb[94].mxu1 }
 0x1b0   :  { %v3074_v45 = vpop.f32.mrb[95].mxu0  ;;  %v3102_v5 = vpop.f32.mrb[95].mxu1 }
 0x1b1   :  { %v1247_v23 = vrot.slane %v3072_v35, 2  ;;  %v1606_v52 = vrot.slane %v4467_v33, 3  ;;  %v3075_v1 = vadd.f32 %v3074_v45, %v3073_v27  ;;  %v3103_v49 = vadd.f32 %v3102_v5, %v3101_v38 }
 0x1b3   :  { %v1255_v53 = vsel %vm1251_vm1, %v1246_v37, %v1247_v23  ;;  %v1248_v54 = vrot.slane %v3075_v1, 2  ;;  %v1607_v43 = vrot.slane %v3103_v49, 3 }
 0x1b4   :  { %v4474_v13 = vadd.f32 %v1255_v53, %v4430_v59  ;;  %v3469_v59 = vld [vmem:[%s4884_s5 + $0x20] sm:$0xff]  }
 0x1b5   :  { %v1254_v21 = vsel %vm1251_vm1, %v1247_v23, %v1248_v54  ;;  %v1669_v25 = vsel %vm1638_vm2, %v1606_v52, %v1607_v43  ;;  %v3076_v28 = vpop.f32.mrb[96].mxu0  ;;  %v3104_v31 = vpop.f32.mrb[96].mxu1  ;;  %3324 = vmatpush3.bf16.msra.mxu1 %v3469_v59 }
 0x1b6   :  { %v4482_v32 = vadd.f32 %v1254_v21, %v915_v3  ;;  %v1671_v12 = vadd.f32 %v1669_v25, %v4269_v19  ;;  %v3077_v51 = vpop.f32.mrb[97].mxu0  ;;  %v3105_v29 = vpop.f32.mrb[97].mxu1  ;;  %3325 = vmatprep.subr.bf16.mxu1 %v3490_v17 }
 0x1b7   :  { %v3078_v37 = vadd.f32 %v3077_v51, %v3076_v28  ;;  %v3106_v47 = vadd.f32 %v3105_v29, %v3104_v31  ;;  %v3079_v62 = vpop.f32.mrb[98].mxu0  ;;  %v3107_v42 = vpop.f32.mrb[98].mxu1 }
 0x1b8   :  { %v3080_v57 = vpop.f32.mrb[99].mxu0  ;;  %v3108_v18 = vpop.f32.mrb[99].mxu1 }
 0x1b9   :  { %v1249_v35 = vrot.slane %v3078_v37, 2  ;;  %v1608_v27 = vrot.slane %v3106_v47, 3  ;;  %v3081_v38 = vadd.f32 %v3080_v57, %v3079_v62  ;;  %v3109_v3 = vadd.f32 %v3108_v18, %v3107_v42 }
 0x1bb   :  { %v1253_v19 = vsel %vm1251_vm1, %v1248_v54, %v1249_v35  ;;  %v1668_v45 = vsel %vm1638_vm2, %v1607_v43, %v1608_v27  ;;  %v1250_v5 = vrot.slane %v3081_v38, 2  ;;  %v1609_v23 = vrot.slane %v3109_v3, 3 }
 0x1bc   :  { %v4494_v1 = vadd.f32 %v1253_v19, %v4443_v7  ;;  %v1672_v49 = vadd.f32 %v1668_v45, %v4284_v40 }
 0x1bd   :  { %v1252_v53 = vsel %vm1251_vm1, %v1249_v35, %v1250_v5  ;;  %v1283_v21 = vsel %vm1251_vm1, %v1250_v5, %v1219_v55  ;;  %v1667_v54 = vsel %vm1638_vm2, %v1608_v27, %v1609_v23  ;;  %v3110_v25 = vpop.f32.mrb[100].mxu1  ;;  %v3210_v43 = vpop.f32.mrb[100].mxu0 }
 0x1be   :  { %v4505_v28 = vadd.f32 %v1252_v53, %v923_v44  ;;  %v4507_v31 = vadd.f32 %v1283_v21, %v926_v20  ;;  %v1673_v7 = vadd.f32 %v1667_v54, %v4289_v16  ;;  %v3111_v40 = vpop.f32.mrb[101].mxu1  ;;  %v3211_v51 = vpop.f32.mrb[101].mxu0  ;;  %v4534_v21 = vld [vmem:[%s4885_s3] ss:$0 sm:$0xff] }
 0x1bf   :  { %v3112_v29 = vadd.f32 %v3111_v40, %v3110_v25  ;;  %v4510_v59 = vadd.f32 %v3211_v51, %v3210_v43  ;;  %v3113_v14 = vpop.f32.mrb[102].mxu1  ;;  %v3213_v37 = vpop.f32.mrb[102].mxu0 }
 0x1c0   :  { %v3114_v47 = vpop.f32.mrb[103].mxu1  ;;  %v3214_v55 = vpop.f32.mrb[103].mxu0 }
 0x1c1   :  { %v1610_v62 = vrot.slane %v3112_v29, 3  ;;  %v3115_v42 = vadd.f32 %v3114_v47, %v3113_v14  ;;  %v3215_v57 = vadd.f32 %v3214_v55, %v3213_v37  ;;  %v1993_v20 = vrot.slane %v4510_v59, 4 }
 0x1c3   :  { %v1666_v44 = vsel %vm1638_vm2, %v1609_v23, %v1610_v62  ;;  %v1611_v16 = vrot.slane %v3115_v42, 3  ;;  %v1994_v18 = vrot.slane %v3215_v57, 4 }
 0x1c4   :  { %v4517_v35 = vadd.f32 %v1666_v44, %v4299_v58  ;;  %v3470_v58 = vld [vmem:[%s4884_s5 + $0x28] sm:$0xff]  }
 0x1c5   :  { %v1665_v27 = vsel %vm1638_vm2, %v1610_v62, %v1611_v16  ;;  %v2056_v38 = vsel %vm2025_vm3, %v1993_v20, %v1994_v18  ;;  %v3116_v3 = vpop.f32.mrb[104].mxu1  ;;  %v3216_v19 = vpop.f32.mrb[104].mxu0  ;;  %3326 = vmatpush3.bf16.msra.mxu1 %v3470_v58 }
 0x1c6   :  { %v4526_v45 = vadd.f32 %v1665_v27, %v4304_v15  ;;  %v2058_v5 = vadd.f32 %v2056_v38, %v1671_v12  ;;  %v3117_v23 = vpop.f32.mrb[105].mxu1  ;;  %v3217_v53 = vpop.f32.mrb[105].mxu0  ;;  %3327 = vmatprep.subr.bf16.mxu1 %v3490_v17 }
 0x1c7   :  { %v3118_v54 = vadd.f32 %v3117_v23, %v3116_v3  ;;  %v3218_v25 = vadd.f32 %v3217_v53, %v3216_v19  ;;  %v3119_v43 = vpop.f32.mrb[106].mxu1  ;;  %v3219_v40 = vpop.f32.mrb[106].mxu0 }
 0x1c8   :  { %v3120_v51 = vpop.f32.mrb[107].mxu1  ;;  %v3220_v29 = vpop.f32.mrb[107].mxu0  ;;  %v2097_v47 = vadd.f32 %v4534_v21, %v2058_v5 }
 0x1c9   :  { %v1612_v15 = vrot.slane %v3118_v54, 3  ;;  %v1995_v12 = vrot.slane %v3218_v25, 4  ;;  %v3121_v14 = vadd.f32 %v3120_v51, %v3119_v43  ;;  %v3221_v37 = vadd.f32 %v3220_v29, %v3219_v40 }
 0x1ca   :  { %v2129_v23 = vmax.f32 %v2097_v47, 0.0 }
 0x1cb   :  { %v1664_v55 = vsel %vm1638_vm2, %v1611_v16, %v1612_v15  ;;  %v2055_v62 = vsel %vm2025_vm3, %v1994_v18, %v1995_v12  ;;  %v1613_v42 = vrot.slane %v3121_v14, 3  ;;  %v1996_v57 = vrot.slane %v3221_v37, 4 }
 0x1cc   :  { %v4543_v44 = vadd.f32 %v1664_v55, %v4313_v60  ;;  %v2059_v27 = vadd.f32 %v2055_v62, %v1672_v49  ;;  %v4556_v60 = vld [vmem:[%s4886_s4] sm:$0xff]  ;;  %v4561_v49 = vld [vmem:[%s4886_s4 + $0x8] sm:$0xff] }
 0x1cd   :  { %v1663_v38 = vsel %vm1638_vm2, %v1612_v15, %v1613_v42  ;;  %v2054_v3 = vsel %vm2025_vm3, %v1995_v12, %v1996_v57  ;;  %v3122_v19 = vpop.f32.mrb[108].mxu1  ;;  %v3222_v5 = vpop.f32.mrb[108].mxu0  ;;  %v2163_v55 = vmul.f32 %v4556_v60, %v2129_v23 }
 0x1ce   :  { %v2098_v16 = vadd.f32 %v4534_v21, %v2059_v27  ;;  %v4551_v53 = vadd.f32 %v1663_v38, %v4317_v0  ;;  %v2060_v18 = vadd.f32 %v2054_v3, %v1673_v7  ;;  %v3123_v58 = vpop.f32.mrb[109].mxu1  ;;  %v3223_v54 = vpop.f32.mrb[109].mxu0  ;;  %v3471_v27 = vld [vmem:[%s4884_s5 + $0x30] sm:$0xff]  }
 0x1cf   :  { %v3124_v25 = vadd.f32 %v3123_v58, %v3122_v19  ;;  %v3224_v43 = vadd.f32 %v3223_v54, %v3222_v5  ;;  %v3125_v40 = vpop.f32.mrb[110].mxu1  ;;  %v3225_v51 = vpop.f32.mrb[110].mxu0  ;;  %3328 = vmatpush3.bf16.msra.mxu1 %v3471_v27  ;;  %v3472_v58 = vld [vmem:[%s4884_s5 + $0x38] sm:$0xff]  }
 0x1d0   :  { %v2130_v29 = vmax.f32 %v2098_v16, 0.0  ;;  %v2099_v0 = vadd.f32 %v4534_v21, %v2060_v18  ;;  %v3126_v7 = vpop.f32.mrb[111].mxu1  ;;  %v3226_v15 = vpop.f32.mrb[111].mxu0  ;;  %3329 = vmatprep.subr.bf16.mxu1 %v3490_v17 }
 0x1d1   :  { %v1614_v12 = vrot.slane %v3124_v25, 3  ;;  %v1997_v14 = vrot.slane %v3224_v43, 4  ;;  %v3127_v37 = vadd.f32 %v3126_v7, %v3125_v40  ;;  %v3227_v47 = vadd.f32 %v3226_v15, %v3225_v51 }
 0x1d2   :  { %v2164_v62 = vmul.f32 %v4561_v49, %v2130_v29 }
 0x1d3   :  { %v1662_v38 = vsel %vm1638_vm2, %v1613_v42, %v1614_v12  ;;  %v2053_v3 = vsel %vm2025_vm3, %v1996_v57, %v1997_v14  ;;  %v1615_v19 = vrot.slane %v3127_v37, 3  ;;  %v1998_v5 = vrot.slane %v3227_v47, 4  ;;  %3330 = vmatpush3.bf16.msra.mxu1 %v3472_v58 }
 0x1d4   :  { %v2195_v16 = vmax.f32 %v2163_v55, %v2164_v62  ;;  %v4575_v23 = vadd.f32 %v1662_v38, %v4329_v36  ;;  %v2061_v18 = vadd.f32 %v2053_v3, %v4517_v35  ;;  %v2131_v42 = vmax.f32 %v2099_v0, 0.0 }
 0x1d5   :  { %v1661_v57 = vsel %vm1638_vm2, %v1614_v12, %v1615_v19  ;;  %v2052_v54 = vsel %vm2025_vm3, %v1997_v14, %v1998_v5  ;;  %v3128_v25 = vpop.f32.mrb[112].mxu1  ;;  %v3228_v43 = vpop.f32.mrb[112].mxu0 }
 0x1d6   :  { %v2196_v36 = vrot.slane %v2195_v16, 4  ;;  %v2100_v40 = vadd.f32 %v4534_v21, %v2061_v18  ;;  %v4588_v35 = vadd.f32 %v1661_v57, %v4333_v39  ;;  %v2062_v51 = vadd.f32 %v2052_v54, %v4526_v45  ;;  %v3129_v29 = vpop.f32.mrb[113].mxu1  ;;  %v3229_v0 = vpop.f32.mrb[113].mxu0 }
 0x1d7   :  { %v3130_v7 = vadd.f32 %v3129_v29, %v3128_v25  ;;  %v3230_v15 = vadd.f32 %v3229_v0, %v3228_v43  ;;  %v3131_v12 = vpop.f32.mrb[114].mxu1  ;;  %v3231_v37 = vpop.f32.mrb[114].mxu0  ;;  %v2165_v45 = vmul.f32 %v4556_v60, %v2131_v42 }
 0x1d8   :  { %v2197_v47 = vmax.f32 %v2195_v16, %v2196_v36  ;;  %v2132_v14 = vmax.f32 %v2100_v40, 0.0  ;;  %v2101_v55 = vadd.f32 %v4534_v21, %v2062_v51  ;;  %v3132_v62 = vpop.f32.mrb[115].mxu1  ;;  %v3232_v17 = vpop.f32.mrb[115].mxu0 }
 0x1d9   :  { %v1616_v27 = vrot.slane %v3130_v7, 3  ;;  %v1999_v38 = vrot.slane %v3230_v15, 4  ;;  %v3133_v3 = vadd.f32 %v3132_v62, %v3131_v12  ;;  %v3233_v39 = vadd.f32 %v3232_v17, %v3231_v37 }
 0x1da   :  { %v2198_v18 = vrot.slane %v2197_v47, 2  ;;  %v2166_v57 = vmul.f32 %v4561_v49, %v2132_v14  ;;  %v2133_v51 = vmax.f32 %v2101_v55, 0.0 }
 0x1db   :  { %v1660_v54 = vsel %vm1638_vm2, %v1615_v19, %v1616_v27  ;;  %v2051_v16 = vsel %vm2025_vm3, %v1998_v5, %v1999_v38  ;;  %v1617_v25 = vrot.slane %v3133_v3, 3  ;;  %v2000_v43 = vrot.slane %v3233_v39, 4 }
 0x1dc   :  { %v2199_v36 = vmax.f32 %v2197_v47, %v2198_v18  ;;  %v2202_v40 = vmax.f32 %v2165_v45, %v2166_v57  ;;  %v4599_v58 = vadd.f32 %v1660_v54, %v4342_v4  ;;  %v2063_v29 = vadd.f32 %v2051_v16, %v4543_v44 }
 0x1dd   :  { %v1659_v42 = vsel %vm1638_vm2, %v1616_v27, %v1617_v25  ;;  %v2050_v0 = vsel %vm2025_vm3, %v1999_v38, %v2000_v43  ;;  %v3134_v19 = vpop.f32.mrb[116].mxu1  ;;  %v3234_v7 = vpop.f32.mrb[116].mxu0 }
 0x1de   :  { %v2200_v15 = vrot.slane %v2199_v36, 1  ;;  %v2203_v5 = vrot.slane %v2202_v40, 4  ;;  %v4607_v12 = vadd.f32 %v1659_v42, %v4346_v8  ;;  %v2064_v37 = vadd.f32 %v2050_v0, %v4551_v53  ;;  %v3135_v4 = vpop.f32.mrb[117].mxu1  ;;  %v3235_v47 = vpop.f32.mrb[117].mxu0 }
 0x1df   :  { %v2102_v14 = vadd.f32 %v4534_v21, %v2063_v29  ;;  %v3136_v44 = vadd.f32 %v3135_v4, %v3134_v19  ;;  %v3236_v55 = vadd.f32 %v3235_v47, %v3234_v7  ;;  %v3137_v62 = vpop.f32.mrb[118].mxu1  ;;  %v3237_v17 = vpop.f32.mrb[118].mxu0  ;;  %v2167_v42 = vmul.f32 %v4556_v60, %v2133_v51 }
 0x1e0   :  { %v2201_v27 = vmax.f32 %v2199_v36, %v2200_v15  ;;  %v2204_v3 = vmax.f32 %v2202_v40, %v2203_v5  ;;  %v2103_v38 = vadd.f32 %v4534_v21, %v2064_v37  ;;  %v3138_v39 = vpop.f32.mrb[119].mxu1  ;;  %v3238_v18 = vpop.f32.mrb[119].mxu0 }
 0x1e1   :  { %v2134_v45 = vmax.f32 %v2102_v14, 0.0  ;;  %v1618_v57 = vrot.slane %v3136_v44, 3  ;;  %v2001_v8 = vrot.slane %v3236_v55, 4  ;;  %v3139_v54 = vadd.f32 %v3138_v39, %v3137_v62 }
 0x1e2   :  { %v2307_v16 = vpack.c.bf16 %v2201_v27, %v2201_v27  ;;  %v2205_v53 = vrot.slane %v2204_v3, 2  ;;  %v3239_v0 = vadd.f32 %v3238_v18, %v3237_v17  ;;  %v2135_v15 = vmax.f32 %v2103_v38, 0.0 }
 0x1e3   :  { %v2168_v29 = vmul.f32 %v4561_v49, %v2134_v45  ;;  %v1658_v19 = vsel %vm1638_vm2, %v1617_v25, %v1618_v57  ;;  %v2049_v36 = vsel %vm2025_vm3, %v2000_v43, %v2001_v8  ;;  %v1619_v40 = vrot.slane %v3139_v54, 3 }
 0x1e4   :  { %v2206_v7 = vmax.f32 %v2204_v3, %v2205_v53  ;;  %v4619_v5 = vadd.f32 %v1658_v19, %v4355_v6  ;;  %v2065_v4 = vadd.f32 %v2049_v36, %v4575_v23  ;;  %v2002_v47 = vrot.slane %v3239_v0, 4 }
 0x1e5   :  { %v2209_v37 = vmax.f32 %v2167_v42, %v2168_v29  ;;  %v1657_v51 = vsel %vm1638_vm2, %v1618_v57, %v1619_v40  ;;  %v3140_v14 = vpop.f32.mrb[120].mxu1  ;;  %v3240_v44 = vpop.f32.mrb[120].mxu0  ;;  %v2362_v55 = vunpack.c.l.b16 %v2307_v16  ;;  %v2169_v45 = vmul.f32 %v4556_v60, %v2135_v15 }
 0x1e6   :  { %v2207_v25 = vrot.slane %v2206_v7, 1  ;;  %v4625_v43 = vadd.f32 %v1657_v51, %v4359_v61  ;;  %v3141_v62 = vpop.f32.mrb[121].mxu1  ;;  %v3241_v17 = vpop.f32.mrb[121].mxu0  ;;  %v2104_v6 = vadd.f32 %v4534_v21, %v2065_v4  ;;  %v2048_v23 = vsel %vm2025_vm3, %v2001_v8, %v2002_v47 }
 0x1e7   :  { %v2210_v27 = vrot.slane %v2209_v37, 4  ;;  %v3142_v3 = vadd.f32 %v3141_v62, %v3140_v14  ;;  %v3143_v38 = vpop.f32.mrb[122].mxu1  ;;  %v3243_v39 = vpop.f32.mrb[122].mxu0  ;;  %v2066_v57 = vadd.f32 %v2048_v23, %v4588_v35  ;;  %v3242_v54 = vadd.f32 %v3241_v17, %v3240_v44 }
 0x1e8   :  { %v2208_v18 = vmax.f32 %v2206_v7, %v2207_v25  ;;  %v3144_v16 = vpop.f32.mrb[123].mxu1  ;;  %v3244_v61 = vpop.f32.mrb[123].mxu0  ;;  %v2136_v42 = vmax.f32 %v2104_v6, 0.0 }
 0x1e9   :  { %v2211_v53 = vmax.f32 %v2209_v37, %v2210_v27  ;;  %v1620_v0 = vrot.slane %v3142_v3, 3  ;;  %v3145_v29 = vadd.f32 %v3144_v16, %v3143_v38  ;;  %v2105_v36 = vadd.f32 %v4534_v21, %v2066_v57 }
 0x1ea   :  { %v2308_v19 = vpack.c.bf16 %v2208_v18, %v2208_v18  ;;  %v2003_v4 = vrot.slane %v3242_v54, 4  ;;  %v3245_v8 = vadd.f32 %v3244_v61, %v3243_v39  ;;  %v2170_v14 = vmul.f32 %v4561_v49, %v2136_v42 }
 0x1eb   :  { %v2212_v51 = vrot.slane %v2211_v53, 2  ;;  %v1656_v7 = vsel %vm1638_vm2, %v1619_v40, %v1620_v0  ;;  %v1621_v15 = vrot.slane %v3145_v29, 3  ;;  %v2137_v44 = vmax.f32 %v2105_v36, 0.0 }
 0x1ec   :  { %v2363_v35 = vunpack.c.l.b16 %v2308_v19  ;;  %v4637_v25 = vadd.f32 %v1656_v7, %v4373_v9  ;;  %v2047_v37 = vsel %vm2025_vm3, %v2002_v47, %v2003_v4  ;;  %v2216_v17 = vmax.f32 %v2169_v45, %v2170_v14 }
 0x1ed   :  { %v2213_v62 = vmax.f32 %v2211_v53, %v2212_v51  ;;  %v2067_v27 = vadd.f32 %v2047_v37, %v4599_v58  ;;  %v1655_v6 = vsel %vm1638_vm2, %v1620_v0, %v1621_v15  ;;  %v3146_v23 = vpop.f32.mrb[124].mxu1  ;;  %v3246_v3 = vpop.f32.mrb[124].mxu0  ;;  %v2004_v9 = vrot.slane %v3245_v8, 4 }
 0x1ee   :  { %v4645_v40 = vsel %vm2378_vm5, %v2363_v35, %v2362_v55  ;;  %v4648_v38 = vadd.f32 %v1655_v6, %v4377_v56  ;;  %v3147_v39 = vpop.f32.mrb[125].mxu1  ;;  %v3247_v18 = vpop.f32.mrb[125].mxu0  ;;  %v2217_v47 = vrot.slane %v2216_v17, 4  ;;  %v2171_v61 = vmul.f32 %v4556_v60, %v2137_v44 }
 0x1ef   :  { %v2214_v57 = vrot.slane %v2213_v62, 1  ;;  %v2106_v45 = vadd.f32 %v4534_v21, %v2067_v27  ;;  %v3148_v54 = vadd.f32 %v3147_v39, %v3146_v23  ;;  %v3149_v58 = vpop.f32.mrb[126].mxu1  ;;  %v3249_v16 = vpop.f32.mrb[126].mxu0  ;;  %v2046_v53 = vsel %vm2025_vm3, %v2003_v4, %v2004_v9 }
 0x1f0   :  { %v3248_v55 = vadd.f32 %v3247_v18, %v3246_v3  ;;  %v3150_v42 = vpop.f32.mrb[127].mxu1  ;;  %v3250_v0 = vpop.f32.mrb[127].mxu0  ;;  %v2218_v29 = vmax.f32 %v2216_v17, %v2217_v47  ;;  %v2068_v36 = vadd.f32 %v2046_v53, %v4607_v12 }
 0x1f1   :  { %v2215_v56 = vmax.f32 %v2213_v62, %v2214_v57  ;;  %v2138_v19 = vmax.f32 %v2106_v45, 0.0  ;;  %v1622_v8 = vrot.slane %v3148_v54, 3  ;;  %v3151_v14 = vadd.f32 %v3150_v42, %v3149_v58 }
 0x1f2   :  { %v2005_v51 = vrot.slane %v3248_v55, 4  ;;  %v3251_v7 = vadd.f32 %v3250_v0, %v3249_v16  ;;  %v2219_v37 = vrot.slane %v2218_v29, 2  ;;  %v2107_v44 = vadd.f32 %v4534_v21, %v2068_v36 }
 0x1f3   :  { %v2309_v35 = vpack.c.bf16 %v2215_v56, %v2215_v56  ;;  %v2172_v27 = vmul.f32 %v4561_v49, %v2138_v19  ;;  %v1654_v4 = vsel %vm1638_vm2, %v1621_v15, %v1622_v8  ;;  %v1623_v17 = vrot.slane %v3151_v14, 3 }
 0x1f4   :  { %v2045_v62 = vsel %vm2025_vm3, %v2004_v9, %v2005_v51  ;;  %v2006_v6 = vrot.slane %v3251_v7, 4  ;;  %v2220_v12 = vmax.f32 %v2218_v29, %v2219_v37  ;;  %v4664_v57 = vadd.f32 %v1654_v4, %v4386_v24 }
 0x1f5   :  { %v4661_v23 = vunpack.c.l.b16 %v2309_v35  ;;  %v2223_v3 = vmax.f32 %v2171_v61, %v2172_v27  ;;  %v3152_v39 = vpop.f32.mrb[128].mxu1  ;;  %v3252_v18 = vpop.f32.mrb[128].mxu0  ;;  %v2069_v47 = vadd.f32 %v2045_v62, %v4619_v5  ;;  %v1653_v15 = vsel %vm1638_vm2, %v1622_v8, %v1623_v17 }
 0x1f6   :  { %v2044_v9 = vsel %vm2025_vm3, %v2005_v51, %v2006_v6  ;;  %v3153_v45 = vpop.f32.mrb[129].mxu1  ;;  %v3253_v54 = vpop.f32.mrb[129].mxu0  ;;  %v2221_v58 = vrot.slane %v2220_v12, 1  ;;  %v2139_v53 = vmax.f32 %v2107_v44, 0.0  ;;  %v4672_v61 = vadd.f32 %v1653_v15, %v4393_v26 }
 0x1f7   :  { %v2224_v16 = vrot.slane %v2223_v3, 4  ;;  %v3155_v55 = vpop.f32.mrb[130].mxu1  ;;  %v3255_v42 = vpop.f32.mrb[130].mxu0  ;;  %v2108_v24 = vadd.f32 %v4534_v21, %v2069_v47  ;;  %v2070_v5 = vadd.f32 %v2044_v9, %v4625_v43  ;;  %v3154_v0 = vadd.f32 %v3153_v45, %v3152_v39 }
 0x1f8   :  { %v3254_v56 = vadd.f32 %v3253_v54, %v3252_v18  ;;  %v3156_v29 = vpop.f32.mrb[131].mxu1  ;;  %v3256_v19 = vpop.f32.mrb[131].mxu0  ;;  %v2222_v36 = vmax.f32 %v2220_v12, %v2221_v58  ;;  %v2173_v47 = vmul.f32 %v4556_v60, %v2139_v53 }
 0x1f9   :  { %v2225_v8 = vmax.f32 %v2223_v3, %v2224_v16  ;;  %v3157_v51 = vadd.f32 %v3156_v29, %v3155_v55  ;;  %v3257_v14 = vadd.f32 %v3256_v19, %v3255_v42  ;;  %v2140_v7 = vmax.f32 %v2108_v24, 0.0 }
 0x1fa   :  { %v2109_v35 = vadd.f32 %v4534_v21, %v2070_v5  ;;  %v1624_v37 = vrot.slane %v3154_v0, 3  ;;  %v2007_v26 = vrot.slane %v3254_v56, 4  ;;  %v2310_v27 = vpack.c.bf16 %v2222_v36, %v2222_v36 }
 0x1fb   :  { %v2226_v44 = vrot.slane %v2225_v8, 2  ;;  %v1625_v4 = vrot.slane %v3157_v51, 3  ;;  %v2008_v62 = vrot.slane %v3257_v14, 4  ;;  %v2174_v43 = vmul.f32 %v4561_v49, %v2140_v7 }
 0x1fc   :  { %v1652_v39 = vsel %vm1638_vm2, %v1623_v17, %v1624_v37  ;;  %v2043_v12 = vsel %vm2025_vm3, %v2006_v6, %v2007_v26  ;;  %v2141_v18 = vmax.f32 %v2109_v35, 0.0  ;;  %v2365_v58 = vunpack.c.l.b16 %v2310_v27 }
 0x1fd   :  { %v2227_v3 = vmax.f32 %v2225_v8, %v2226_v44  ;;  %v4684_v15 = vadd.f32 %v1652_v39, %v4403_v48  ;;  %v2071_v9 = vadd.f32 %v2043_v12, %v4637_v25  ;;  %v3158_v45 = vpop.f32.mrb[132].mxu1  ;;  %v3258_v54 = vpop.f32.mrb[132].mxu0  ;;  %v2230_v16 = vmax.f32 %v2173_v47, %v2174_v43 }
 0x1fe   :  { %v1651_v53 = vsel %vm1638_vm2, %v1624_v37, %v1625_v4  ;;  %v2042_v17 = vsel %vm2025_vm3, %v2007_v26, %v2008_v62  ;;  %v3159_v55 = vpop.f32.mrb[133].mxu1  ;;  %v3259_v6 = vpop.f32.mrb[133].mxu0  ;;  %v2381_v51 = vsel %vm2380_vm6, %v4661_v23, %v4645_v40  ;;  %v2175_v47 = vmul.f32 %v4556_v60, %v2141_v18 }
 0x1ff   :  { %v2228_v42 = vrot.slane %v2227_v3, 1  ;;  %v2110_v24 = vadd.f32 %v4534_v21, %v2071_v9  ;;  %v4693_v48 = vadd.f32 %v1651_v53, %v4407_v2  ;;  %v2072_v25 = vadd.f32 %v2042_v17, %v4648_v38  ;;  %v3161_v5 = vpop.f32.mrb[134].mxu1  ;;  %v3261_v0 = vpop.f32.mrb[134].mxu0 }
 0x200   :  { %v2231_v56 = vrot.slane %v2230_v16, 4  ;;  %v3160_v29 = vadd.f32 %v3159_v55, %v3158_v45  ;;  %v3260_v19 = vadd.f32 %v3259_v6, %v3258_v54  ;;  %v3162_v36 = vpop.f32.mrb[135].mxu1  ;;  %v3262_v8 = vpop.f32.mrb[135].mxu0 }
 0x201   :  { %v2229_v14 = vmax.f32 %v2227_v3, %v2228_v42  ;;  %v2142_v7 = vmax.f32 %v2110_v24, 0.0  ;;  %v2111_v35 = vadd.f32 %v4534_v21, %v2072_v25  ;;  %v3163_v37 = vadd.f32 %v3162_v36, %v3161_v5 }
 0x202   :  { %v2232_v2 = vmax.f32 %v2230_v16, %v2231_v56  ;;  %v1626_v26 = vrot.slane %v3160_v29, 3  ;;  %v2009_v27 = vrot.slane %v3260_v19, 4  ;;  %v3263_v38 = vadd.f32 %v3262_v8, %v3261_v0 }
 0x203   :  { %v2311_v44 = vpack.c.bf16 %v2229_v14, %v2229_v14  ;;  %v2176_v43 = vmul.f32 %v4561_v49, %v2142_v7  ;;  %v1627_v39 = vrot.slane %v3163_v37, 3  ;;  %v2143_v54 = vmax.f32 %v2111_v35, 0.0 }
 0x204   :  { %v2233_v12 = vrot.slane %v2232_v2, 2  ;;  %v1650_v9 = vsel %vm1638_vm2, %v1625_v4, %v1626_v26  ;;  %v2041_v40 = vsel %vm2025_vm3, %v2008_v62, %v2009_v27  ;;  %v2010_v23 = vrot.slane %v3263_v38, 4 }
 0x205   :  { %v4706_v3 = vunpack.c.l.b16 %v2311_v44  ;;  %v2237_v45 = vmax.f32 %v2175_v47, %v2176_v43  ;;  %v4709_v16 = vadd.f32 %v1650_v9, %v4419_v63  ;;  %v3164_v53 = vpop.f32.mrb[136].mxu1  ;;  %v3264_v18 = vpop.f32.mrb[136].mxu0  ;;  %v2073_v55 = vadd.f32 %v2041_v40, %v4664_v57 }
 0x206   :  { %v2234_v17 = vmax.f32 %v2232_v2, %v2233_v12  ;;  %v1649_v4 = vsel %vm1638_vm2, %v1626_v26, %v1627_v39  ;;  %v2040_v62 = vsel %vm2025_vm3, %v2009_v27, %v2010_v23  ;;  %v3165_v6 = vpop.f32.mrb[137].mxu1  ;;  %v3265_v42 = vpop.f32.mrb[137].mxu0  ;;  %v2383_v14 = vsel %vm2382_vm7, %v2365_v58, %v2381_v51 }
 0x207   :  { %v2238_v24 = vrot.slane %v2237_v45, 4  ;;  %v4717_v25 = vadd.f32 %v1649_v4, %v4423_v41  ;;  %v2074_v63 = vadd.f32 %v2040_v62, %v4672_v61  ;;  %v3166_v5 = vadd.f32 %v3165_v6, %v3164_v53  ;;  %v3167_v0 = vpop.f32.mrb[138].mxu1  ;;  %v3267_v56 = vpop.f32.mrb[138].mxu0 }
 0x208   :  { %v2235_v29 = vrot.slane %v2234_v17, 1  ;;  %v2112_v57 = vadd.f32 %v4534_v21, %v2073_v55  ;;  %v3266_v19 = vadd.f32 %v3265_v42, %v3264_v18  ;;  %v3168_v36 = vpop.f32.mrb[139].mxu1  ;;  %v3268_v8 = vpop.f32.mrb[139].mxu0  ;;  %v2177_v44 = vmul.f32 %v4556_v60, %v2143_v54 }
 0x209   :  { %v2239_v7 = vmax.f32 %v2237_v45, %v2238_v24  ;;  %v2113_v35 = vadd.f32 %v4534_v21, %v2074_v63  ;;  %v1628_v37 = vrot.slane %v3166_v5, 3  ;;  %v3169_v2 = vadd.f32 %v3168_v36, %v3167_v0 }
 0x20a   :  { %v2236_v41 = vmax.f32 %v2234_v17, %v2235_v29  ;;  %v2144_v26 = vmax.f32 %v2112_v57, 0.0  ;;  %v2011_v27 = vrot.slane %v3266_v19, 4  ;;  %v3269_v61 = vadd.f32 %v3268_v8, %v3267_v56 }
 0x20b   :  { %v2240_v38 = vrot.slane %v2239_v7, 2  ;;  %v1648_v47 = vsel %vm1638_vm2, %v1627_v39, %v1628_v37  ;;  %v1629_v43 = vrot.slane %v3169_v2, 3  ;;  %v2145_v17 = vmax.f32 %v2113_v35, 0.0 }
 0x20c   :  { %v2312_v12 = vpack.c.bf16 %v2236_v41, %v2236_v41  ;;  %v2178_v9 = vmul.f32 %v4561_v49, %v2144_v26  ;;  %v4728_v58 = vadd.f32 %v1648_v47, %v4433_v22  ;;  %v2039_v51 = vsel %vm2025_vm3, %v2010_v23, %v2011_v27 }
 0x20d   :  { %v2241_v40 = vmax.f32 %v2239_v7, %v2240_v38  ;;  %v2075_v45 = vadd.f32 %v2039_v51, %v4684_v15  ;;  %v1647_v53 = vsel %vm1638_vm2, %v1628_v37, %v1629_v43  ;;  %v3170_v54 = vpop.f32.mrb[140].mxu1  ;;  %v3270_v18 = vpop.f32.mrb[140].mxu0  ;;  %v2012_v4 = vrot.slane %v3269_v61, 4 }
 0x20e   :  { %v2244_v39 = vmax.f32 %v2177_v44, %v2178_v9  ;;  %v4736_v55 = vadd.f32 %v1647_v53, %v4437_v46  ;;  %v3171_v22 = vpop.f32.mrb[141].mxu1  ;;  %v3271_v62 = vpop.f32.mrb[141].mxu0  ;;  %v2367_v5 = vunpack.c.l.b16 %v2312_v12  ;;  %v2385_v46 = vsel %vm2384_vm8, %v4706_v3, %v2383_v14 }
 0x20f   :  { %v2242_v6 = vrot.slane %v2241_v40, 1  ;;  %v2114_v23 = vadd.f32 %v4534_v21, %v2075_v45  ;;  %v3172_v42 = vadd.f32 %v3171_v22, %v3170_v54  ;;  %v3272_v24 = vadd.f32 %v3271_v62, %v3270_v18  ;;  %v3173_v15 = vpop.f32.mrb[142].mxu1  ;;  %v3273_v63 = vpop.f32.mrb[142].mxu0 }
 0x210   :  { %v2245_v0 = vrot.slane %v2244_v39, 4  ;;  %v2038_v56 = vsel %vm2025_vm3, %v2011_v27, %v2012_v4  ;;  %v3174_v29 = vpop.f32.mrb[143].mxu1  ;;  %v3274_v57 = vpop.f32.mrb[143].mxu0  ;;  %v2179_v26 = vmul.f32 %v4556_v60, %v2145_v17 }
 0x211   :  { %v2243_v19 = vmax.f32 %v2241_v40, %v2242_v6  ;;  %v2146_v36 = vmax.f32 %v2114_v23, 0.0  ;;  %v2076_v8 = vadd.f32 %v2038_v56, %v4693_v48  ;;  %v1630_v7 = vrot.slane %v3172_v42, 3 }
 0x212   :  { %v2246_v35 = vmax.f32 %v2244_v39, %v2245_v0  ;;  %v2013_v37 = vrot.slane %v3272_v24, 4  ;;  %v3175_v2 = vadd.f32 %v3174_v29, %v3173_v15  ;;  %v3275_v41 = vadd.f32 %v3274_v57, %v3273_v63 }
 0x213   :  { %v2180_v61 = vmul.f32 %v4561_v49, %v2146_v36  ;;  %v2115_v27 = vadd.f32 %v4534_v21, %v2076_v8  ;;  %v1646_v38 = vsel %vm1638_vm2, %v1629_v43, %v1630_v7  ;;  %v2313_v53 = vpack.c.bf16 %v2243_v19, %v2243_v19 }
 0x214   :  { %v2247_v44 = vrot.slane %v2246_v35, 2  ;;  %v4750_v3 = vadd.f32 %v1646_v38, %v4446_v30  ;;  %v2037_v48 = vsel %vm2025_vm3, %v2012_v4, %v2013_v37  ;;  %v1631_v14 = vrot.slane %v3175_v2, 3 }
 0x215   :  { %v2251_v47 = vmax.f32 %v2179_v26, %v2180_v61  ;;  %v2147_v12 = vmax.f32 %v2115_v27, 0.0  ;;  %v2077_v9 = vadd.f32 %v2037_v48, %v4709_v16  ;;  %v2014_v51 = vrot.slane %v3275_v41, 4  ;;  %v3176_v40 = vpop.f32.mrb[144].mxu1  ;;  %v3276_v45 = vpop.f32.mrb[144].mxu0 }
 0x216   :  { %v2248_v54 = vmax.f32 %v2246_v35, %v2247_v44  ;;  %v1645_v43 = vsel %vm1638_vm2, %v1630_v7, %v1631_v14  ;;  %v3177_v18 = vpop.f32.mrb[145].mxu1  ;;  %v3277_v39 = vpop.f32.mrb[145].mxu0  ;;  %v4758_v30 = vsel %vm2386_vm9, %v2367_v5, %v2385_v46 }
 0x217   :  { %v2252_v17 = vrot.slane %v2251_v47, 4  ;;  %v2181_v4 = vmul.f32 %v4556_v60, %v2147_v12  ;;  %v2116_v22 = vadd.f32 %v4534_v21, %v2077_v9  ;;  %v4763_v16 = vadd.f32 %v1645_v43, %v4453_v50  ;;  %v3179_v62 = vpop.f32.mrb[146].mxu1  ;;  %v3279_v6 = vpop.f32.mrb[146].mxu0 }
 0x218   :  { %v2249_v23 = vrot.slane %v2248_v54, 1  ;;  %v2036_v42 = vsel %vm2025_vm3, %v2013_v37, %v2014_v51  ;;  %v3178_v24 = vadd.f32 %v3177_v18, %v3176_v40  ;;  %v3278_v15 = vadd.f32 %v3277_v39, %v3276_v45  ;;  %v3180_v63 = vpop.f32.mrb[147].mxu1  ;;  %v3280_v0 = vpop.f32.mrb[147].mxu0 }
 0x219   :  { %v2253_v5 = vmax.f32 %v2251_v47, %v2252_v17  ;;  %v2148_v56 = vmax.f32 %v2116_v22, 0.0  ;;  %v2078_v29 = vadd.f32 %v2036_v42, %v4717_v25  ;;  %v3181_v57 = vadd.f32 %v3180_v63, %v3179_v62 }
 0x21a   :  { %v1632_v46 = vrot.slane %v3178_v24, 3  ;;  %v2015_v19 = vrot.slane %v3278_v15, 4  ;;  %v3281_v36 = vadd.f32 %v3280_v0, %v3279_v6  ;;  %v2250_v50 = vmax.f32 %v2248_v54, %v2249_v23 }
 0x21b   :  { %v2254_v8 = vrot.slane %v2253_v5, 2  ;;  %v2182_v7 = vmul.f32 %v4561_v49, %v2148_v56  ;;  %v2117_v35 = vadd.f32 %v4534_v21, %v2078_v29  ;;  %v1633_v2 = vrot.slane %v3181_v57, 3 }
 0x21c   :  { %v1644_v37 = vsel %vm1638_vm2, %v1631_v14, %v1632_v46  ;;  %v2035_v41 = vsel %vm2025_vm3, %v2014_v51, %v2015_v19  ;;  %v2016_v26 = vrot.slane %v3281_v36, 4  ;;  %v2314_v61 = vpack.c.bf16 %v2250_v50, %v2250_v50 }
 0x21d   :  { %v2255_v25 = vmax.f32 %v2253_v5, %v2254_v8  ;;  %v2258_v27 = vmax.f32 %v2181_v4, %v2182_v7  ;;  %v4775_v38 = vadd.f32 %v1644_v37, %v4461_v11  ;;  %v3182_v44 = vpop.f32.mrb[148].mxu1  ;;  %v3282_v48 = vpop.f32.mrb[148].mxu0  ;;  %v2368_v47 = vunpack.c.l.b16 %v2313_v53 }
 0x21e   :  { %v2149_v12 = vmax.f32 %v2117_v35, 0.0  ;;  %v2079_v9 = vadd.f32 %v2035_v41, %v4728_v58  ;;  %v1643_v14 = vsel %vm1638_vm2, %v1632_v46, %v1633_v2  ;;  %v2034_v51 = vsel %vm2025_vm3, %v2015_v19, %v2016_v26  ;;  %v3183_v40 = vpop.f32.mrb[149].mxu1  ;;  %v3283_v45 = vpop.f32.mrb[149].mxu0 }
 0x21f   :  { %v2256_v54 = vrot.slane %v2255_v25, 1  ;;  %v2259_v43 = vrot.slane %v2258_v27, 4  ;;  %v4783_v11 = vadd.f32 %v1643_v14, %v4465_v10  ;;  %v3185_v18 = vpop.f32.mrb[150].mxu1  ;;  %v3285_v39 = vpop.f32.mrb[150].mxu0  ;;  %v4785_v53 = vunpack.c.l.b16 %v2314_v61 }
 0x220   :  { %v2118_v17 = vadd.f32 %v4534_v21, %v2079_v9  ;;  %v2080_v58 = vadd.f32 %v2034_v51, %v4736_v55  ;;  %v3184_v4 = vadd.f32 %v3183_v40, %v3182_v44  ;;  %v3284_v22 = vadd.f32 %v3283_v45, %v3282_v48  ;;  %v3186_v62 = vpop.f32.mrb[151].mxu1  ;;  %v3286_v6 = vpop.f32.mrb[151].mxu0 }
 0x221   :  { %v2257_v23 = vmax.f32 %v2255_v25, %v2256_v54  ;;  %v2260_v42 = vmax.f32 %v2258_v27, %v2259_v43  ;;  %v3187_v24 = vadd.f32 %v3186_v62, %v3185_v18  ;;  %v3287_v15 = vadd.f32 %v3286_v6, %v3285_v39 }
 0x222   :  { %v2150_v63 = vmax.f32 %v2118_v17, 0.0  ;;  %v2119_v10 = vadd.f32 %v4534_v21, %v2080_v58  ;;  %v1634_v0 = vrot.slane %v3184_v4, 3  ;;  %v2017_v5 = vrot.slane %v3284_v22, 4 }
 0x223   :  { %v2315_v56 = vpack.c.bf16 %v2257_v23, %v2257_v23  ;;  %v2261_v29 = vrot.slane %v2260_v42, 2  ;;  %v1635_v57 = vrot.slane %v3187_v24, 3  ;;  %v2018_v46 = vrot.slane %v3287_v15, 4 }
 0x224   :  { %v2183_v19 = vmul.f32 %v4556_v60, %v2149_v12  ;;  %v2184_v55 = vmul.f32 %v4561_v49, %v2150_v63  ;;  %v1642_v36 = vsel %vm1638_vm2, %v1633_v2, %v1634_v0  ;;  %v2033_v50 = vsel %vm2025_vm3, %v2016_v26, %v2017_v5 }
 0x225   :  { %v2262_v8 = vmax.f32 %v2260_v42, %v2261_v29  ;;  %v2151_v7 = vmax.f32 %v2119_v10, 0.0  ;;  %v4797_v35 = vadd.f32 %v1642_v36, %v4474_v13  ;;  %v2081_v37 = vadd.f32 %v2033_v50, %v4750_v3  ;;  %v3188_v41 = vpop.f32.mrb[152].mxu1  ;;  %v3288_v61 = vpop.f32.mrb[152].mxu0 }
 0x226   :  { %v2370_v25 = vunpack.c.l.b16 %v2315_v56  ;;  %v2265_v27 = vmax.f32 %v2183_v19, %v2184_v55  ;;  %v1641_v44 = vsel %vm1638_vm2, %v1634_v0, %v1635_v57  ;;  %v2032_v2 = vsel %vm2025_vm3, %v2017_v5, %v2018_v46  ;;  %v3189_v48 = vpop.f32.mrb[153].mxu1  ;;  %v3289_v12 = vpop.f32.mrb[153].mxu0 }
 0x227   :  { %v2263_v26 = vrot.slane %v2262_v8, 1  ;;  %v2120_v9 = vadd.f32 %v4534_v21, %v2081_v37  ;;  %v4806_v13 = vadd.f32 %v1641_v44, %v4482_v32  ;;  %v2082_v3 = vadd.f32 %v2032_v2, %v4763_v16  ;;  %v3191_v14 = vpop.f32.mrb[154].mxu1  ;;  %v3291_v51 = vpop.f32.mrb[154].mxu0 }
 0x228   :  { %v2266_v40 = vrot.slane %v2265_v27, 4  ;;  %v3190_v45 = vadd.f32 %v3189_v48, %v3188_v41  ;;  %v3290_v54 = vadd.f32 %v3289_v12, %v3288_v61  ;;  %v3192_v43 = vpop.f32.mrb[155].mxu1  ;;  %v3292_v18 = vpop.f32.mrb[155].mxu0  ;;  %v2389_v39 = vsel %vm2388_vm10, %v2368_v47, %v4758_v30 }
 0x229   :  { %v2264_v17 = vmax.f32 %v2262_v8, %v2263_v26  ;;  %v2152_v58 = vmax.f32 %v2120_v9, 0.0  ;;  %v2121_v4 = vadd.f32 %v4534_v21, %v2082_v3  ;;  %v3193_v22 = vadd.f32 %v3192_v43, %v3191_v14 }
 0x22a   :  { %v2267_v62 = vmax.f32 %v2265_v27, %v2266_v40  ;;  %v1636_v32 = vrot.slane %v3190_v45, 3  ;;  %v2019_v6 = vrot.slane %v3290_v54, 4  ;;  %v3293_v23 = vadd.f32 %v3292_v18, %v3291_v51 }
 0x22b   :  { %v2316_v16 = vpack.c.bf16 %v2264_v17, %v2264_v17  ;;  %v2185_v42 = vmul.f32 %v4556_v60, %v2151_v7  ;;  %v2186_v24 = vmul.f32 %v4561_v49, %v2152_v58  ;;  %v1637_v15 = vrot.slane %v3193_v22, 3 }
 0x22c   :  { %v2268_v63 = vrot.slane %v2267_v62, 2  ;;  %v1640_v10 = vsel %vm1638_vm2, %v1635_v57, %v1636_v32  ;;  %v2031_v30 = vsel %vm2025_vm3, %v2018_v46, %v2019_v6  ;;  %v2020_v47 = vrot.slane %v3293_v23, 4 }
 0x22d   :  { %v2371_v0 = vunpack.c.l.b16 %v2316_v16  ;;  %v2272_v5 = vmax.f32 %v2185_v42, %v2186_v24  ;;  %v2153_v56 = vmax.f32 %v2121_v4, 0.0  ;;  %v4819_v29 = vadd.f32 %v1640_v10, %v4494_v1  ;;  %v3294_v19 = vpop.f32.mrb[156].mxu0  ;;  %v3488_v10 = vld [vmem:[%s4886_s4] sm:$0xff] }
 0x22e   :  { %v2269_v55 = vmax.f32 %v2267_v62, %v2268_v63  ;;  %v2083_v36 = vadd.f32 %v2031_v30, %v4775_v38  ;;  %v1639_v50 = vsel %vm1638_vm2, %v1636_v32, %v1637_v15  ;;  %v1670_v57 = vsel %vm1638_vm2, %v1637_v15, %v1606_v52  ;;  %v3295_v46 = vpop.f32.mrb[157].mxu0 }
 0x22f   :  { %v2392_v8 = vsel %vm2378_vm5, %v2371_v0, %v2370_v25  ;;  %v2273_v7 = vrot.slane %v2272_v5, 4  ;;  %v1701_v37 = vadd.f32 %v1639_v50, %v4505_v28  ;;  %v1702_v1 = vadd.f32 %v1670_v57, %v4507_v31  ;;  %v3297_v41 = vpop.f32.mrb[158].mxu0 }
 0x230   :  { %v2270_v61 = vrot.slane %v2269_v55, 1  ;;  %v2122_v38 = vadd.f32 %v4534_v21, %v2083_v36  ;;  %v2030_v27 = vsel %vm2025_vm3, %v2019_v6, %v2020_v47  ;;  %v3296_v44 = vadd.f32 %v3295_v46, %v3294_v19  ;;  %v3298_v33 = vpop.f32.mrb[159].mxu0  ;;  %v3487_v21 = vld [vmem:[%s4885_s3] ss:$0 sm:$0xff] }
 0x231   :  { %v2274_v2 = vmax.f32 %v2272_v5, %v2273_v7  ;;  %v2084_v52 = vadd.f32 %v2030_v27, %v4783_v11  ;;  %v3299_v48 = vadd.f32 %v3298_v33, %v3297_v41  ;;  %v4837_v25 = vsel %vm2390_vm11, %v4785_v53, %v2389_v39 }
 0x232   :  { %v2271_v28 = vmax.f32 %v2269_v55, %v2270_v61  ;;  %v2154_v12 = vmax.f32 %v2122_v38, 0.0  ;;  %v2021_v31 = vrot.slane %v3296_v44, 4  ;;  %v2187_v51 = vmul.f32 %v4556_v60, %v2153_v56 }
 0x233   :  { %v2275_v26 = vrot.slane %v2274_v2, 2  ;;  %v2123_v9 = vadd.f32 %v3487_v21, %v2084_v52  ;;  %v2022_v3 = vrot.slane %v3299_v48, 4 }
 0x234   :  { %v2317_v14 = vpack.c.bf16 %v2271_v28, %v2271_v28  ;;  %v2188_v11 = vmul.f32 %v4561_v49, %v2154_v12  ;;  %v2029_v40 = vsel %vm2025_vm3, %v2020_v47, %v2021_v31  ;;  %v3489_v47 = vld [vmem:[%s4886_s4 + $0x8] sm:$0xff] }
 0x235   :  { %v2276_v53 = vmax.f32 %v2274_v2, %v2275_v26  ;;  %v2085_v45 = vadd.f32 %v2029_v40, %v4797_v35  ;;  %v2028_v54 = vsel %vm2025_vm3, %v2021_v31, %v2022_v3  ;;  %v3300_v43 = vpop.f32.mrb[160].mxu0  ;;  %v2155_v17 = vmax.f32 %v2123_v9, 0.0 }
 0x236   :  { %v2372_v18 = vunpack.c.l.b16 %v2317_v14  ;;  %v2279_v39 = vmax.f32 %v2187_v51, %v2188_v11  ;;  %v2086_v58 = vadd.f32 %v2028_v54, %v4806_v13  ;;  %v3301_v4 = vpop.f32.mrb[161].mxu0 }
 0x237   :  { %v2277_v22 = vrot.slane %v2276_v53, 1  ;;  %v2124_v60 = vadd.f32 %v3487_v21, %v2085_v45  ;;  %v3302_v62 = vadd.f32 %v3301_v4, %v3300_v43  ;;  %v3303_v49 = vpop.f32.mrb[162].mxu0  ;;  %v2189_v13 = vmul.f32 %v3488_v10, %v2155_v17 }
 0x238   :  { %v2280_v32 = vrot.slane %v2279_v39, 4  ;;  %v2125_v6 = vadd.f32 %v3487_v21, %v2086_v58  ;;  %v3304_v23 = vpop.f32.mrb[163].mxu0  ;;  %v2393_v16 = vsel %vm2380_vm6, %v2372_v18, %v2392_v8 }
 0x239   :  { %v2278_v35 = vmax.f32 %v2276_v53, %v2277_v22  ;;  %v2156_v42 = vmax.f32 %v2124_v60, 0.0  ;;  %v2023_v24 = vrot.slane %v3302_v62, 4  ;;  %v3305_v15 = vadd.f32 %v3304_v23, %v3303_v49 }
 0x23a   :  { %v2281_v63 = vmax.f32 %v2279_v39, %v2280_v32  ;;  %v2157_v55 = vmax.f32 %v2125_v6, 0.0 }
 0x23b   :  { %v2318_v30 = vpack.c.bf16 %v2278_v35, %v2278_v35  ;;  %v2190_v0 = vmul.f32 %v3489_v47, %v2156_v42  ;;  %v2027_v5 = vsel %vm2025_vm3, %v2022_v3, %v2023_v24  ;;  %v2024_v56 = vrot.slane %v3305_v15, 4 }
 0x23c   :  { %v2282_v19 = vrot.slane %v2281_v63, 2  ;;  %v2087_v36 = vadd.f32 %v2027_v5, %v4819_v29  ;;  %v2191_v28 = vmul.f32 %v3488_v10, %v2157_v55 }
 0x23d   :  { %v2373_v50 = vunpack.c.l.b16 %v2318_v30  ;;  %v2286_v57 = vmax.f32 %v2189_v13, %v2190_v0  ;;  %v2026_v46 = vsel %vm2025_vm3, %v2023_v24, %v2024_v56  ;;  %v2057_v8 = vsel %vm2025_vm3, %v2024_v56, %v1993_v20 }
 0x23e   :  { %v2283_v7 = vmax.f32 %v2281_v63, %v2282_v19  ;;  %v2126_v41 = vadd.f32 %v3487_v21, %v2087_v36  ;;  %v2088_v61 = vadd.f32 %v2026_v46, %v1701_v37  ;;  %v2089_v38 = vadd.f32 %v2057_v8, %v1702_v1 }
 0x23f   :  { %v2287_v27 = vrot.slane %v2286_v57, 4  ;;  %v2394_v44 = vsel %vm2382_vm7, %v2373_v50, %v2393_v16 }
 0x240   :  { %v2284_v33 = vrot.slane %v2283_v7, 1  ;;  %v2158_v2 = vmax.f32 %v2126_v41, 0.0  ;;  %v2127_v29 = vadd.f32 %v3487_v21, %v2088_v61  ;;  %v2128_v52 = vadd.f32 %v3487_v21, %v2089_v38 }
 0x241   :  { %v2288_v48 = vmax.f32 %v2286_v57, %v2287_v27 }
 0x242   :  { %v2285_v12 = vmax.f32 %v2283_v7, %v2284_v33  ;;  %v2192_v31 = vmul.f32 %v3489_v47, %v2158_v2  ;;  %v2159_v26 = vmax.f32 %v2127_v29, 0.0  ;;  %v2160_v59 = vmax.f32 %v2128_v52, 0.0 }
 0x243   :  { %v2289_v9 = vrot.slane %v2288_v48, 2 }
 0x244   :  { %v2319_v34 = vpack.c.bf16 %v2285_v12, %v2285_v12  ;;  %v2293_v20 = vmax.f32 %v2191_v28, %v2192_v31  ;;  %v2193_v3 = vmul.f32 %v3488_v10, %v2159_v26  ;;  %v2194_v14 = vmul.f32 %v3489_v47, %v2160_v59  ;;  %v2737_v10 = vld [vmem:[%s4887_s6] ss:$0 sm:$0xff] }
 0x245   :  { %v2290_v37 = vmax.f32 %v2288_v48, %v2289_v9 }
 0x246   :  { %v2374_v1 = vunpack.c.l.b16 %v2319_v34  ;;  %v2294_v51 = vrot.slane %v2293_v20, 4  ;;  %v2300_v11 = vmax.f32 %v2193_v3, %v2194_v14 }
 0x247   :  { %v2291_v40 = vrot.slane %v2290_v37, 1 }
 0x248   :  { %v2295_v53 = vmax.f32 %v2293_v20, %v2294_v51  ;;  %v2301_v45 = vrot.slane %v2300_v11, 4  ;;  %v2395_v21 = vsel %vm2384_vm8, %v2374_v1, %v2394_v44 }
 0x249   :  { %v2292_v54 = vmax.f32 %v2290_v37, %v2291_v40 }
 0x24a   :  { %v2296_v43 = vrot.slane %v2295_v53, 2  ;;  %v2302_v18 = vmax.f32 %v2300_v11, %v2301_v45 }
 0x24b   :  { %v2320_v39 = vpack.c.bf16 %v2292_v54, %v2292_v54 }
 0x24c   :  { %v2297_v17 = vmax.f32 %v2295_v53, %v2296_v43  ;;  %v2303_v58 = vrot.slane %v2302_v18, 2 }
 0x24d   :  { %v2375_v4 = vunpack.c.l.b16 %v2320_v39 }
 0x24e   :  { %v2298_v22 = vrot.slane %v2297_v17, 1  ;;  %v2304_v60 = vmax.f32 %v2302_v18, %v2303_v58 }
 0x24f   :  { %v2396_v62 = vsel %vm2386_vm9, %v2375_v4, %v2395_v21 }
 0x250   :  { %v2299_v49 = vmax.f32 %v2297_v17, %v2298_v22  ;;  %v2305_v32 = vrot.slane %v2304_v60, 1 }
 0x252   :  { %v2321_v6 = vpack.c.bf16 %v2299_v49, %v2299_v49  ;;  %v2306_v23 = vmax.f32 %v2304_v60, %v2305_v32 }
 0x254   :  { %v2322_v16 = vpack.c.bf16 %v2306_v23, %v2306_v23  ;;  %v2376_v35 = vunpack.c.l.b16 %v2321_v6 }
 0x256   :  { %v2377_v42 = vunpack.c.l.b16 %v2322_v16  ;;  %v2397_v24 = vsel %vm2388_vm10, %v2376_v35, %v2396_v62 }
 0x258   :  { %v2398_v15 = vsel %vm2390_vm11, %v2377_v42, %v2397_v24 }
 0x259   :  { %v2399_v63 = vpack.c.b16 %v2398_v15, %v4837_v25 }
 0x25b   :  { %3332 = vmatmul.mubr.bf16.vlgmr.msra.gmra.mrb[156].mxu1 %v2399_v63 }
 0x32e   :  { %v2483_v13 = vpop.f32.mrb[156].mxu1 }
 0x32f   :  { %v2484_v30 = vadd.f32 %v2737_v10, %v2483_v13  ;;  %v3333_v47 = vpop.f32.mrb[157].mxu1 }
 0x330   :  { %v2486_v0 = vpop.f32.mrb[158].mxu1 }
 0x331   :  { %2490 = vst [vmem:[%s4888_s7] sm:$0xff] %v2484_v30  ;;  %v2487_v5 = vadd.f32 %v2737_v10, %v2486_v0  ;;  %v3334_v56 = vpop.f32.mrb[159].mxu1 }
 0x333   :  { %2491 = vst [vmem:[%s4888_s7 + $0x8] sm:$0xff] %v2487_v5 }

</bundles_post_ra>
